<compile_context>
chip_gen: v5e
topology: v5e:2x2
jax: 0.10.0
libtpu: 0.0.40
codegen_flags: <defaults>
</compile_context>

<pallas_src>
import functools
import numpy as np
import jax
import jax.numpy as jnp
from jax import lax
from jax.experimental import pallas as pl
from jax.experimental.pallas import tpu as pltpu

_MATMUL_DTYPE = jnp.bfloat16   # MXU operand dtype; accumulation stays f32.
_B_CHUNK = 8                   # full sublane group per batch tile.


def _lstm_chunk_kernel(len_ref, gx_ref, whh_ref, h0_ref, c0_ref,
                       y_ref, hn_ref, cn_ref, h_scr, c_scr, *, t_chunk):
    """Grid = (batch_tile, time_chunk); one grid step runs t_chunk LSTM steps."""
    tc = pl.program_id(1)

    @pl.when(tc == 0)
    def _():
        h_scr[...] = h0_ref[...].astype(jnp.float32)
        c_scr[...] = c0_ref[...].astype(jnp.float32)

    lengths = len_ref[...]                        # (Bc, 1) int32, resident
    t_base = tc * t_chunk
    H = h_scr.shape[-1]

    def step(i, carry):
        h_prev, c_prev = carry                    # f32 (Bc, H)
        gx = gx_ref[i]                            # (Bc, 4H) f32 = x@W_ih^T + b
        # Only the recurrent matmul lives in the serial loop (bf16 -> f32 acc).
        gates = gx + jnp.dot(h_prev.astype(whh_ref.dtype), whh_ref[...],
                             preferred_element_type=jnp.float32)
        # PyTorch gate order: [i | f | g | o].
        i_g = jax.nn.sigmoid(gates[:, 0 * H:1 * H])
        f_g = jax.nn.sigmoid(gates[:, 1 * H:2 * H])
        g_g = jnp.tanh(gates[:, 2 * H:3 * H])
        o_g = jax.nn.sigmoid(gates[:, 3 * H:4 * H])
        c_new = f_g * c_prev + i_g * g_g
        h_new = o_g * jnp.tanh(c_new)
        # pack_padded_sequence semantics: past a sequence's length the state is
        # frozen (so final h/c is the last *valid* step) and y is zero-padded.
        valid = (t_base + i) < lengths            # (Bc, 1) bool
        h_upd = jnp.where(valid, h_new, h_prev)
        c_upd = jnp.where(valid, c_new, c_prev)
        y_ref[i] = jnp.where(valid, h_new, 0.0).astype(y_ref.dtype)
        return h_upd, c_upd

    h_fin, c_fin = lax.fori_loop(0, t_chunk, step,
                                 (h_scr[...], c_scr[...]), unroll=True)
    h_scr[...] = h_fin
    c_scr[...] = c_fin

    @pl.when(tc == pl.num_programs(1) - 1)
    def _():
        hn_ref[...] = h_fin.astype(hn_ref.dtype)
        cn_ref[...] = c_fin.astype(cn_ref.dtype)


def lstm_pallas(gx_tbg, lengths_b1, w_hh_t, h0, c0, *, t_chunk, b_chunk=_B_CHUNK):
    """gx_tbg: [T, B, 4H] f32 precomputed input gates; returns (y, h_n, c_n)."""
    T, B, G = gx_tbg.shape
    H = h0.shape[-1]
    assert G == 4 * H
    assert T % t_chunk == 0 and B % b_chunk == 0

    out_shape = (
        jax.ShapeDtypeStruct((T, B, H), jnp.float32),   # y (time-major)
        jax.ShapeDtypeStruct((B, H), jnp.float32),      # h_n
        jax.ShapeDtypeStruct((B, H), jnp.float32),      # c_n
    )
    grid_spec = pltpu.PrefetchScalarGridSpec(
        num_scalar_prefetch=0,
        grid=(B // b_chunk, T // t_chunk),
        in_specs=[
            pl.BlockSpec((b_chunk, 1), lambda b, tc: (b, 0)),              # lengths
            pl.BlockSpec((t_chunk, b_chunk, 4 * H), lambda b, tc: (tc, b, 0)),  # gates_x
            pl.BlockSpec((H, 4 * H), lambda b, tc: (0, 0)),                # W_hh^T (resident)
            pl.BlockSpec((b_chunk, H), lambda b, tc: (b, 0)),              # h0
            pl.BlockSpec((b_chunk, H), lambda b, tc: (b, 0)),              # c0
        ],
        out_specs=[
            pl.BlockSpec((t_chunk, b_chunk, H), lambda b, tc: (tc, b, 0)),  # y chunk
            pl.BlockSpec((b_chunk, H), lambda b, tc: (b, 0)),               # h_n (resident)
            pl.BlockSpec((b_chunk, H), lambda b, tc: (b, 0)),               # c_n (resident)
        ],
        scratch_shapes=[pltpu.VMEM((b_chunk, H), jnp.float32)] * 2,        # h, c carries
    )
    kernel = functools.partial(_lstm_chunk_kernel, t_chunk=t_chunk)
    return pl.pallas_call(
        kernel,
        out_shape=out_shape,
        grid_spec=grid_spec,
        compiler_params=pltpu.CompilerParams(
            # Batch tiles are independent -> megacore split on v7x; the time
            # axis carries the recurrence -> arbitrary.
            dimension_semantics=("parallel", "arbitrary"),
            vmem_limit_bytes=32 * 1024 * 1024,
        ),
    )(lengths_b1, gx_tbg, w_hh_t, h0, c0)


def _input_projection(x_tbi, w_ih, b_ih, b_hh):
    """Hoisted (T*B, I) x (I, 4H) matmul + bias, bf16 operands, f32 accumulate."""
    w_ih_t = jnp.transpose(w_ih).astype(_MATMUL_DTYPE)     # [I, 4H]
    bias = (b_ih + b_hh).astype(jnp.float32)               # [4H]
    return jnp.dot(x_tbi.astype(_MATMUL_DTYPE), w_ih_t,
                   preferred_element_type=jnp.float32) + bias


def var_rnn_forward(x, x_len, params, hidden=None, *, t_chunk=8):
    """JAX/Pallas equivalent of VarRNN.forward with rnn = nn.LSTM(I, H, 1).

    x: [B, T, I] float32; x_len: lengths (len B) or None; hidden: optional
    (h0, c0) each [1, B, H].  Returns (y, (h_n, c_n)) with y: [B, max_len, H]
    zero-padded past each length, h_n/c_n: [1, B, H] in original batch order.
    """
    w_ih, w_hh, b_ih, b_hh = params
    B, T, I = x.shape
    H = w_hh.shape[1]

    if x_len is None:
        lengths = np.full((B,), T, dtype=np.int32)
    else:
        lengths = np.asarray(x_len, dtype=np.int32)
    t_max = int(lengths.max())                     # pad_packed_sequence pads to max len

    # Pad batch to full sublanes and time to a multiple of the time chunk;
    # padded rows get length 0 (masked everywhere) and zero initial state.
    b_chunk = _B_CHUNK
    t_chunk = max(1, min(t_chunk, t_max))
    B_pad = ((B + b_chunk - 1) // b_chunk) * b_chunk
    T_pad = ((t_max + t_chunk - 1) // t_chunk) * t_chunk

    x_tbi = jnp.transpose(x[:, :t_max, :], (1, 0, 2))                  # [t_max, B, I]
    x_tbi = jnp.pad(x_tbi, ((0, T_pad - t_max), (0, B_pad - B), (0, 0)))

    if hidden is None:
        h0 = jnp.zeros((B_pad, H), jnp.float32)
        c0 = jnp.zeros((B_pad, H), jnp.float32)
    else:
        h0 = jnp.pad(hidden[0][0].astype(jnp.float32), ((0, B_pad - B), (0, 0)))
        c0 = jnp.pad(hidden[1][0].astype(jnp.float32), ((0, B_pad - B), (0, 0)))

    lengths_pad = np.zeros((B_pad, 1), np.int32)
    lengths_pad[:B, 0] = lengths
    lengths_pad = jnp.asarray(lengths_pad)

    gx = _input_projection(x_tbi, w_ih, b_ih, b_hh)                    # [T_pad, B_pad, 4H]
    w_hh_t = jnp.transpose(w_hh).astype(_MATMUL_DTYPE)                 # [H, 4H]

    y_tbh, h_n, c_n = lstm_pallas(gx, lengths_pad, w_hh_t, h0, c0,
                                  t_chunk=t_chunk, b_chunk=b_chunk)
    y = jnp.transpose(y_tbh[:t_max, :B, :], (1, 0, 2)).astype(x.dtype)  # [B, t_max, H]
    return y, (h_n[None, :B, :].astype(x.dtype), c_n[None, :B, :].astype(x.dtype))


def _lstm_reference(gx, lengths_b1, w_hh_t_mm, h0, c0):
    """Pure-JAX reference (lax.scan), same dtype policy as the kernel."""
    H = h0.shape[-1]

    def step(carry, g_x):
        h, c, t = carry
        gates = g_x + jnp.dot(h.astype(w_hh_t_mm.dtype), w_hh_t_mm,
                              preferred_element_type=jnp.float32)
        i = jax.nn.sigmoid(gates[:, :H])
        f = jax.nn.sigmoid(gates[:, H:2 * H])
        g = jnp.tanh(gates[:, 2 * H:3 * H])
        o = jax.nn.sigmoid(gates[:, 3 * H:])
        c_new = f * c + i * g
        h_new = o * jnp.tanh(c_new)
        valid = t < lengths_b1
        h_u = jnp.where(valid, h_new, h)
        c_u = jnp.where(valid, c_new, c)
        return (h_u, c_u, t + 1), jnp.where(valid, h_new, 0.0)

    (h_n, c_n, _), y = lax.scan(
        step, (h0.astype(jnp.float32), c0.astype(jnp.float32), jnp.int32(0)), gx)
    return y, h_n, c_n


if __name__ == "__main__":
    B, T, I, H = 8, 16, 16, 32

    key = jax.random.PRNGKey(0)
    k_x, k_wih, k_whh, k_bih, k_bhh, k_h0, k_c0 = jax.random.split(key, 7)

    # Deterministic LSTM parameters (PyTorch-style uniform init, gate order i,f,g,o).
    bound = 1.0 / np.sqrt(H)
    w_ih = jax.random.uniform(k_wih, (4 * H, I), jnp.float32, -bound, bound)
    w_hh = jax.random.uniform(k_whh, (4 * H, H), jnp.float32, -bound, bound)
    b_ih = jax.random.uniform(k_bih, (4 * H,), jnp.float32, -bound, bound)
    b_hh = jax.random.uniform(k_bhh, (4 * H,), jnp.float32, -bound, bound)
    params = (w_ih, w_hh, b_ih, b_hh)

    x = jax.random.normal(k_x, (B, T, I), jnp.float32)
    x_len = np.array([16, 5, 12, 3, 16, 9, 1, 7])          # variable lengths (max == T)
    h0 = 0.1 * jax.random.normal(k_h0, (1, B, H), jnp.float32)
    c0 = 0.1 * jax.random.normal(k_c0, (1, B, H), jnp.float32)

    def check(xb, lens, hid):
        y, (h_n, c_n) = var_rnn_forward(xb, lens, params, hidden=hid)
        y = jax.block_until_ready(y)
        h_n = jax.block_until_ready(h_n)
        c_n = jax.block_until_ready(c_n)

        bsz = xb.shape[0]
        t_max = int(np.asarray(lens).max())
        x_tbi = jnp.transpose(xb[:, :t_max, :], (1, 0, 2))
        gx = _input_projection(x_tbi, w_ih, b_ih, b_hh)
        lens_b1 = jnp.asarray(np.asarray(lens, np.int32)[:, None])
        y_ref, h_ref, c_ref = _lstm_reference(
            gx, lens_b1, jnp.transpose(w_hh).astype(_MATMUL_DTYPE), hid[0][0], hid[1][0])
        y_ref = jnp.transpose(y_ref, (1, 0, 2))

        assert y.shape == (bsz, t_max, H)
        assert h_n.shape == (1, bsz, H) and c_n.shape == (1, bsz, H)
        np.testing.assert_allclose(np.asarray(y), np.asarray(y_ref), rtol=2e-3, atol=2e-3)
        np.testing.assert_allclose(np.asarray(h_n[0]), np.asarray(h_ref), rtol=2e-3, atol=2e-3)
        np.testing.assert_allclose(np.asarray(c_n[0]), np.asarray(c_ref), rtol=2e-3, atol=2e-3)

    # Full sublane-aligned batch (B=8, two time chunks of 8).
    check(x, x_len, (h0, c0))
    # Ragged batch (B=5) exercising the internal batch padding path.
    check(x[:5], x_len[:5], (h0[:, :5, :], c0[:, :5, :]))

    print("KERNEL_OK")
</pallas_src>

<mosaic_0001>
module attributes {stable_mosaic.version = 11 : i64} {
  func.func @_lstm_chunk_kernel(%arg0: i32, %arg1: i32, %arg2: memref<8x1xi32, #tpu.memory_space<vmem>>, %arg3: memref<8x8x128xf32, #tpu.memory_space<vmem>>, %arg4: memref<32x128xbf16, #tpu.memory_space<vmem>>, %arg5: memref<8x32xf32, #tpu.memory_space<vmem>>, %arg6: memref<8x32xf32, #tpu.memory_space<vmem>>, %arg7: memref<8x8x32xf32, #tpu.memory_space<vmem>>, %arg8: memref<8x32xf32, #tpu.memory_space<vmem>>, %arg9: memref<8x32xf32, #tpu.memory_space<vmem>>, %arg10: memref<8x32xf32, #tpu.memory_space<vmem>>, %arg11: memref<8x32xf32, #tpu.memory_space<vmem>>) attributes {dimension_semantics = [#tpu.dimension_semantics<parallel>, #tpu.dimension_semantics<arbitrary>], iteration_bounds = array<i64: 1, 2>, scalar_prefetch = 0 : i64, scratch_operands = 2 : i64, tpu.core_type = #tpu.core_type<tc>, window_params = [{transform_indices = @transform_0, window_bounds = array<i64: 8, 1>}, {transform_indices = @transform_1, window_bounds = array<i64: 8, 8, 128>}, {pipeline_mode = #tpu.pipeline_mode<synchronous>, transform_indices = @transform_2, window_bounds = array<i64: 32, 128>}, {transform_indices = @transform_3, window_bounds = array<i64: 8, 32>}, {transform_indices = @transform_4, window_bounds = array<i64: 8, 32>}, {transform_indices = @transform_5, window_bounds = array<i64: 8, 8, 32>}, {transform_indices = @transform_6, window_bounds = array<i64: 8, 32>}, {transform_indices = @transform_7, window_bounds = array<i64: 8, 32>}]} {
    %c0_i32 = arith.constant 0 : i32
    %0 = arith.cmpi eq, %arg1, %c0_i32 : i32
    %1 = arith.extui %0 : i1 to i32
    %c0_i32_0 = arith.constant 0 : i32
    %2 = arith.cmpi ne, %1, %c0_i32_0 : i32
    scf.if %2 {
      %c0_101 = arith.constant 0 : index
      %c0_102 = arith.constant 0 : index
      %404 = vector.load %arg5[%c0_101, %c0_102] : memref<8x32xf32, #tpu.memory_space<vmem>>, vector<8x32xf32>
      %c0_103 = arith.constant 0 : index
      %c0_104 = arith.constant 0 : index
      %405 = vector.load %arg10[%c0_103, %c0_104] : memref<8x32xf32, #tpu.memory_space<vmem>>, vector<8x32xf32>
      tpu.vector_store %arg10[%c0_103, %c0_104], %404 {strides = array<i32>} : memref<8x32xf32, #tpu.memory_space<vmem>>, vector<8x32xf32>,
      %c0_105 = arith.constant 0 : index
      %c0_106 = arith.constant 0 : index
      %406 = vector.load %arg6[%c0_105, %c0_106] : memref<8x32xf32, #tpu.memory_space<vmem>>, vector<8x32xf32>
      %c0_107 = arith.constant 0 : index
      %c0_108 = arith.constant 0 : index
      %407 = vector.load %arg11[%c0_107, %c0_108] : memref<8x32xf32, #tpu.memory_space<vmem>>, vector<8x32xf32>
      tpu.vector_store %arg11[%c0_107, %c0_108], %406 {strides = array<i32>} : memref<8x32xf32, #tpu.memory_space<vmem>>, vector<8x32xf32>,
    } else {
    }
    %c0 = arith.constant 0 : index
    %c0_1 = arith.constant 0 : index
    %3 = vector.load %arg2[%c0, %c0_1] : memref<8x1xi32, #tpu.memory_space<vmem>>, vector<8x1xi32>
    %c8_i32 = arith.constant 8 : i32
    %4 = arith.muli %arg1, %c8_i32 : i32
    %c0_2 = arith.constant 0 : index
    %c0_3 = arith.constant 0 : index
    %5 = vector.load %arg10[%c0_2, %c0_3] : memref<8x32xf32, #tpu.memory_space<vmem>>, vector<8x32xf32>
    %c0_4 = arith.constant 0 : index
    %c0_5 = arith.constant 0 : index
    %6 = vector.load %arg11[%c0_4, %c0_5] : memref<8x32xf32, #tpu.memory_space<vmem>>, vector<8x32xf32>
    %c0_i32_6 = arith.constant 0 : i32
    %7 = arith.index_cast %c0_i32_6 : i32 to index
    %c0_7 = arith.constant 0 : index
    %c0_8 = arith.constant 0 : index
    %8 = vector.load %arg3[%7, %c0_7, %c0_8] : memref<8x8x128xf32, #tpu.memory_space<vmem>>, vector<1x8x128xf32>
    %9 = vector.shape_cast %8 : vector<1x8x128xf32> to vector<8x128xf32>
    %10 = arith.truncf %5 : vector<8x32xf32> to vector<8x32xbf16>
    %c0_9 = arith.constant 0 : index
    %c0_10 = arith.constant 0 : index
    %11 = vector.load %arg4[%c0_9, %c0_10] : memref<32x128xbf16, #tpu.memory_space<vmem>>, vector<32x128xbf16>
    %cst = arith.constant dense<0.000000e+00> : vector<8x128xf32>
    %12 = tpu.matmul %10, %11, %cst {dimension_numbers = #tpu.dot_dimension_numbers<[1], [0], [0], [1], [0, 0, 1, 1], [], []>} : vector<8x32xbf16>, vector<32x128xbf16>, vector<8x128xf32> -> vector<8x128xf32>
    %13 = arith.addf %9, %12 : vector<8x128xf32>
    %14 = vector.extract_strided_slice %13 {offsets = [0, 0], sizes = [8, 32], strides = [1, 1]} : vector<8x128xf32> to vector<8x32xf32>
    %15 = arith.negf %14 : vector<8x32xf32>
    %16 = math.exp %15 : vector<8x32xf32>
    %cst_11 = arith.constant 1.000000e+00 : f32
    %17 = vector.broadcast %cst_11 : f32 to vector<8x32xf32>
    %18 = arith.addf %17, %16 : vector<8x32xf32>
    %19 = arith.divf %17, %18 : vector<8x32xf32>
    %20 = vector.extract_strided_slice %13 {offsets = [0, 32], sizes = [8, 32], strides = [1, 1]} : vector<8x128xf32> to vector<8x32xf32>
    %21 = arith.negf %20 : vector<8x32xf32>
    %22 = math.exp %21 : vector<8x32xf32>
    %cst_12 = arith.constant 1.000000e+00 : f32
    %23 = vector.broadcast %cst_12 : f32 to vector<8x32xf32>
    %24 = arith.addf %23, %22 : vector<8x32xf32>
    %25 = arith.divf %23, %24 : vector<8x32xf32>
    %26 = vector.extract_strided_slice %13 {offsets = [0, 64], sizes = [8, 32], strides = [1, 1]} : vector<8x128xf32> to vector<8x32xf32>
    %27 = math.tanh %26 : vector<8x32xf32>
    %28 = vector.extract_strided_slice %13 {offsets = [0, 96], sizes = [8, 32], strides = [1, 1]} : vector<8x128xf32> to vector<8x32xf32>
    %29 = arith.negf %28 : vector<8x32xf32>
    %30 = math.exp %29 : vector<8x32xf32>
    %cst_13 = arith.constant 1.000000e+00 : f32
    %31 = vector.broadcast %cst_13 : f32 to vector<8x32xf32>
    %32 = arith.addf %31, %30 : vector<8x32xf32>
    %33 = arith.divf %31, %32 : vector<8x32xf32>
    %34 = arith.mulf %25, %6 : vector<8x32xf32>
    %35 = arith.mulf %19, %27 : vector<8x32xf32>
    %36 = arith.addf %34, %35 : vector<8x32xf32>
    %37 = math.tanh %36 : vector<8x32xf32>
    %38 = arith.mulf %33, %37 : vector<8x32xf32>
    %39 = arith.addi %4, %c0_i32_6 : i32
    %40 = vector.broadcast %39 : i32 to vector<8x1xi32>
    %41 = arith.cmpi slt, %40, %3 : vector<8x1xi32>
    %42 = vector.shape_cast %41 : vector<8x1xi1> to vector<8x1xi1>
    %43 = vector.broadcast %42 : vector<8x1xi1> to vector<8x32xi1>
    %44 = arith.select %43, %38, %5 : vector<8x32xi1>, vector<8x32xf32>
    %45 = vector.shape_cast %41 : vector<8x1xi1> to vector<8x1xi1>
    %46 = vector.broadcast %45 : vector<8x1xi1> to vector<8x32xi1>
    %47 = arith.select %46, %36, %6 : vector<8x32xi1>, vector<8x32xf32>
    %cst_14 = arith.constant 0.000000e+00 : f32
    %48 = vector.shape_cast %41 : vector<8x1xi1> to vector<8x1xi1>
    %49 = vector.broadcast %48 : vector<8x1xi1> to vector<8x32xi1>
    %50 = vector.broadcast %cst_14 : f32 to vector<8x32xf32>
    %51 = arith.select %49, %38, %50 : vector<8x32xi1>, vector<8x32xf32>
    %52 = arith.index_cast %c0_i32_6 : i32 to index
    %c0_15 = arith.constant 0 : index
    %c0_16 = arith.constant 0 : index
    %53 = vector.load %arg7[%52, %c0_15, %c0_16] : memref<8x8x32xf32, #tpu.memory_space<vmem>>, vector<1x8x32xf32>
    %54 = vector.shape_cast %53 : vector<1x8x32xf32> to vector<8x32xf32>
    %55 = vector.shape_cast %51 : vector<8x32xf32> to vector<1x8x32xf32>
    tpu.vector_store %arg7[%52, %c0_15, %c0_16], %55 {strides = array<i32>} : memref<8x8x32xf32, #tpu.memory_space<vmem>>, vector<1x8x32xf32>,
    %c1_i32 = arith.constant 1 : i32
    %56 = arith.index_cast %c1_i32 : i32 to index
    %c0_17 = arith.constant 0 : index
    %c0_18 = arith.constant 0 : index
    %57 = vector.load %arg3[%56, %c0_17, %c0_18] : memref<8x8x128xf32, #tpu.memory_space<vmem>>, vector<1x8x128xf32>
    %58 = vector.shape_cast %57 : vector<1x8x128xf32> to vector<8x128xf32>
    %59 = arith.truncf %44 : vector<8x32xf32> to vector<8x32xbf16>
    %c0_19 = arith.constant 0 : index
    %c0_20 = arith.constant 0 : index
    %60 = vector.load %arg4[%c0_19, %c0_20] : memref<32x128xbf16, #tpu.memory_space<vmem>>, vector<32x128xbf16>
    %cst_21 = arith.constant dense<0.000000e+00> : vector<8x128xf32>
    %61 = tpu.matmul %59, %60, %cst_21 {dimension_numbers = #tpu.dot_dimension_numbers<[1], [0], [0], [1], [0, 0, 1, 1], [], []>} : vector<8x32xbf16>, vector<32x128xbf16>, vector<8x128xf32> -> vector<8x128xf32>
    %62 = arith.addf %58, %61 : vector<8x128xf32>
    %63 = vector.extract_strided_slice %62 {offsets = [0, 0], sizes = [8, 32], strides = [1, 1]} : vector<8x128xf32> to vector<8x32xf32>
    %64 = arith.negf %63 : vector<8x32xf32>
    %65 = math.exp %64 : vector<8x32xf32>
    %cst_22 = arith.constant 1.000000e+00 : f32
    %66 = vector.broadcast %cst_22 : f32 to vector<8x32xf32>
    %67 = arith.addf %66, %65 : vector<8x32xf32>
    %68 = arith.divf %66, %67 : vector<8x32xf32>
    %69 = vector.extract_strided_slice %62 {offsets = [0, 32], sizes = [8, 32], strides = [1, 1]} : vector<8x128xf32> to vector<8x32xf32>
    %70 = arith.negf %69 : vector<8x32xf32>
    %71 = math.exp %70 : vector<8x32xf32>
    %cst_23 = arith.constant 1.000000e+00 : f32
    %72 = vector.broadcast %cst_23 : f32 to vector<8x32xf32>
    %73 = arith.addf %72, %71 : vector<8x32xf32>
    %74 = arith.divf %72, %73 : vector<8x32xf32>
    %75 = vector.extract_strided_slice %62 {offsets = [0, 64], sizes = [8, 32], strides = [1, 1]} : vector<8x128xf32> to vector<8x32xf32>
    %76 = math.tanh %75 : vector<8x32xf32>
    %77 = vector.extract_strided_slice %62 {offsets = [0, 96], sizes = [8, 32], strides = [1, 1]} : vector<8x128xf32> to vector<8x32xf32>
    %78 = arith.negf %77 : vector<8x32xf32>
    %79 = math.exp %78 : vector<8x32xf32>
    %cst_24 = arith.constant 1.000000e+00 : f32
    %80 = vector.broadcast %cst_24 : f32 to vector<8x32xf32>
    %81 = arith.addf %80, %79 : vector<8x32xf32>
    %82 = arith.divf %80, %81 : vector<8x32xf32>
    %83 = arith.mulf %74, %47 : vector<8x32xf32>
    %84 = arith.mulf %68, %76 : vector<8x32xf32>
    %85 = arith.addf %83, %84 : vector<8x32xf32>
    %86 = math.tanh %85 : vector<8x32xf32>
    %87 = arith.mulf %82, %86 : vector<8x32xf32>
    %88 = arith.addi %4, %c1_i32 : i32
    %89 = vector.broadcast %88 : i32 to vector<8x1xi32>
    %90 = arith.cmpi slt, %89, %3 : vector<8x1xi32>
    %91 = vector.shape_cast %90 : vector<8x1xi1> to vector<8x1xi1>
    %92 = vector.broadcast %91 : vector<8x1xi1> to vector<8x32xi1>
    %93 = arith.select %92, %87, %44 : vector<8x32xi1>, vector<8x32xf32>
    %94 = vector.shape_cast %90 : vector<8x1xi1> to vector<8x1xi1>
    %95 = vector.broadcast %94 : vector<8x1xi1> to vector<8x32xi1>
    %96 = arith.select %95, %85, %47 : vector<8x32xi1>, vector<8x32xf32>
    %cst_25 = arith.constant 0.000000e+00 : f32
    %97 = vector.shape_cast %90 : vector<8x1xi1> to vector<8x1xi1>
    %98 = vector.broadcast %97 : vector<8x1xi1> to vector<8x32xi1>
    %99 = vector.broadcast %cst_25 : f32 to vector<8x32xf32>
    %100 = arith.select %98, %87, %99 : vector<8x32xi1>, vector<8x32xf32>
    %101 = arith.index_cast %c1_i32 : i32 to index
    %c0_26 = arith.constant 0 : index
    %c0_27 = arith.constant 0 : index
    %102 = vector.load %arg7[%101, %c0_26, %c0_27] : memref<8x8x32xf32, #tpu.memory_space<vmem>>, vector<1x8x32xf32>
    %103 = vector.shape_cast %102 : vector<1x8x32xf32> to vector<8x32xf32>
    %104 = vector.shape_cast %100 : vector<8x32xf32> to vector<1x8x32xf32>
    tpu.vector_store %arg7[%101, %c0_26, %c0_27], %104 {strides = array<i32>} : memref<8x8x32xf32, #tpu.memory_space<vmem>>, vector<1x8x32xf32>,
    %c2_i32 = arith.constant 2 : i32
    %105 = arith.index_cast %c2_i32 : i32 to index
    %c0_28 = arith.constant 0 : index
    %c0_29 = arith.constant 0 : index
    %106 = vector.load %arg3[%105, %c0_28, %c0_29] : memref<8x8x128xf32, #tpu.memory_space<vmem>>, vector<1x8x128xf32>
    %107 = vector.shape_cast %106 : vector<1x8x128xf32> to vector<8x128xf32>
    %108 = arith.truncf %93 : vector<8x32xf32> to vector<8x32xbf16>
    %c0_30 = arith.constant 0 : index
    %c0_31 = arith.constant 0 : index
    %109 = vector.load %arg4[%c0_30, %c0_31] : memref<32x128xbf16, #tpu.memory_space<vmem>>, vector<32x128xbf16>
    %cst_32 = arith.constant dense<0.000000e+00> : vector<8x128xf32>
    %110 = tpu.matmul %108, %109, %cst_32 {dimension_numbers = #tpu.dot_dimension_numbers<[1], [0], [0], [1], [0, 0, 1, 1], [], []>} : vector<8x32xbf16>, vector<32x128xbf16>, vector<8x128xf32> -> vector<8x128xf32>
    %111 = arith.addf %107, %110 : vector<8x128xf32>
    %112 = vector.extract_strided_slice %111 {offsets = [0, 0], sizes = [8, 32], strides = [1, 1]} : vector<8x128xf32> to vector<8x32xf32>
    %113 = arith.negf %112 : vector<8x32xf32>
    %114 = math.exp %113 : vector<8x32xf32>
    %cst_33 = arith.constant 1.000000e+00 : f32
    %115 = vector.broadcast %cst_33 : f32 to vector<8x32xf32>
    %116 = arith.addf %115, %114 : vector<8x32xf32>
    %117 = arith.divf %115, %116 : vector<8x32xf32>
    %118 = vector.extract_strided_slice %111 {offsets = [0, 32], sizes = [8, 32], strides = [1, 1]} : vector<8x128xf32> to vector<8x32xf32>
    %119 = arith.negf %118 : vector<8x32xf32>
    %120 = math.exp %119 : vector<8x32xf32>
    %cst_34 = arith.constant 1.000000e+00 : f32
    %121 = vector.broadcast %cst_34 : f32 to vector<8x32xf32>
    %122 = arith.addf %121, %120 : vector<8x32xf32>
    %123 = arith.divf %121, %122 : vector<8x32xf32>
    %124 = vector.extract_strided_slice %111 {offsets = [0, 64], sizes = [8, 32], strides = [1, 1]} : vector<8x128xf32> to vector<8x32xf32>
    %125 = math.tanh %124 : vector<8x32xf32>
    %126 = vector.extract_strided_slice %111 {offsets = [0, 96], sizes = [8, 32], strides = [1, 1]} : vector<8x128xf32> to vector<8x32xf32>
    %127 = arith.negf %126 : vector<8x32xf32>
    %128 = math.exp %127 : vector<8x32xf32>
    %cst_35 = arith.constant 1.000000e+00 : f32
    %129 = vector.broadcast %cst_35 : f32 to vector<8x32xf32>
    %130 = arith.addf %129, %128 : vector<8x32xf32>
    %131 = arith.divf %129, %130 : vector<8x32xf32>
    %132 = arith.mulf %123, %96 : vector<8x32xf32>
    %133 = arith.mulf %117, %125 : vector<8x32xf32>
    %134 = arith.addf %132, %133 : vector<8x32xf32>
    %135 = math.tanh %134 : vector<8x32xf32>
    %136 = arith.mulf %131, %135 : vector<8x32xf32>
    %137 = arith.addi %4, %c2_i32 : i32
    %138 = vector.broadcast %137 : i32 to vector<8x1xi32>
    %139 = arith.cmpi slt, %138, %3 : vector<8x1xi32>
    %140 = vector.shape_cast %139 : vector<8x1xi1> to vector<8x1xi1>
    %141 = vector.broadcast %140 : vector<8x1xi1> to vector<8x32xi1>
    %142 = arith.select %141, %136, %93 : vector<8x32xi1>, vector<8x32xf32>
    %143 = vector.shape_cast %139 : vector<8x1xi1> to vector<8x1xi1>
    %144 = vector.broadcast %143 : vector<8x1xi1> to vector<8x32xi1>
    %145 = arith.select %144, %134, %96 : vector<8x32xi1>, vector<8x32xf32>
    %cst_36 = arith.constant 0.000000e+00 : f32
    %146 = vector.shape_cast %139 : vector<8x1xi1> to vector<8x1xi1>
    %147 = vector.broadcast %146 : vector<8x1xi1> to vector<8x32xi1>
    %148 = vector.broadcast %cst_36 : f32 to vector<8x32xf32>
    %149 = arith.select %147, %136, %148 : vector<8x32xi1>, vector<8x32xf32>
    %150 = arith.index_cast %c2_i32 : i32 to index
    %c0_37 = arith.constant 0 : index
    %c0_38 = arith.constant 0 : index
    %151 = vector.load %arg7[%150, %c0_37, %c0_38] : memref<8x8x32xf32, #tpu.memory_space<vmem>>, vector<1x8x32xf32>
    %152 = vector.shape_cast %151 : vector<1x8x32xf32> to vector<8x32xf32>
    %153 = vector.shape_cast %149 : vector<8x32xf32> to vector<1x8x32xf32>
    tpu.vector_store %arg7[%150, %c0_37, %c0_38], %153 {strides = array<i32>} : memref<8x8x32xf32, #tpu.memory_space<vmem>>, vector<1x8x32xf32>,
    %c3_i32 = arith.constant 3 : i32
    %154 = arith.index_cast %c3_i32 : i32 to index
    %c0_39 = arith.constant 0 : index
    %c0_40 = arith.constant 0 : index
    %155 = vector.load %arg3[%154, %c0_39, %c0_40] : memref<8x8x128xf32, #tpu.memory_space<vmem>>, vector<1x8x128xf32>
    %156 = vector.shape_cast %155 : vector<1x8x128xf32> to vector<8x128xf32>
    %157 = arith.truncf %142 : vector<8x32xf32> to vector<8x32xbf16>
    %c0_41 = arith.constant 0 : index
    %c0_42 = arith.constant 0 : index
    %158 = vector.load %arg4[%c0_41, %c0_42] : memref<32x128xbf16, #tpu.memory_space<vmem>>, vector<32x128xbf16>
    %cst_43 = arith.constant dense<0.000000e+00> : vector<8x128xf32>
    %159 = tpu.matmul %157, %158, %cst_43 {dimension_numbers = #tpu.dot_dimension_numbers<[1], [0], [0], [1], [0, 0, 1, 1], [], []>} : vector<8x32xbf16>, vector<32x128xbf16>, vector<8x128xf32> -> vector<8x128xf32>
    %160 = arith.addf %156, %159 : vector<8x128xf32>
    %161 = vector.extract_strided_slice %160 {offsets = [0, 0], sizes = [8, 32], strides = [1, 1]} : vector<8x128xf32> to vector<8x32xf32>
    %162 = arith.negf %161 : vector<8x32xf32>
    %163 = math.exp %162 : vector<8x32xf32>
    %cst_44 = arith.constant 1.000000e+00 : f32
    %164 = vector.broadcast %cst_44 : f32 to vector<8x32xf32>
    %165 = arith.addf %164, %163 : vector<8x32xf32>
    %166 = arith.divf %164, %165 : vector<8x32xf32>
    %167 = vector.extract_strided_slice %160 {offsets = [0, 32], sizes = [8, 32], strides = [1, 1]} : vector<8x128xf32> to vector<8x32xf32>
    %168 = arith.negf %167 : vector<8x32xf32>
    %169 = math.exp %168 : vector<8x32xf32>
    %cst_45 = arith.constant 1.000000e+00 : f32
    %170 = vector.broadcast %cst_45 : f32 to vector<8x32xf32>
    %171 = arith.addf %170, %169 : vector<8x32xf32>
    %172 = arith.divf %170, %171 : vector<8x32xf32>
    %173 = vector.extract_strided_slice %160 {offsets = [0, 64], sizes = [8, 32], strides = [1, 1]} : vector<8x128xf32> to vector<8x32xf32>
    %174 = math.tanh %173 : vector<8x32xf32>
    %175 = vector.extract_strided_slice %160 {offsets = [0, 96], sizes = [8, 32], strides = [1, 1]} : vector<8x128xf32> to vector<8x32xf32>
    %176 = arith.negf %175 : vector<8x32xf32>
    %177 = math.exp %176 : vector<8x32xf32>
    %cst_46 = arith.constant 1.000000e+00 : f32
    %178 = vector.broadcast %cst_46 : f32 to vector<8x32xf32>
    %179 = arith.addf %178, %177 : vector<8x32xf32>
    %180 = arith.divf %178, %179 : vector<8x32xf32>
    %181 = arith.mulf %172, %145 : vector<8x32xf32>
    %182 = arith.mulf %166, %174 : vector<8x32xf32>
    %183 = arith.addf %181, %182 : vector<8x32xf32>
    %184 = math.tanh %183 : vector<8x32xf32>
    %185 = arith.mulf %180, %184 : vector<8x32xf32>
    %186 = arith.addi %4, %c3_i32 : i32
    %187 = vector.broadcast %186 : i32 to vector<8x1xi32>
    %188 = arith.cmpi slt, %187, %3 : vector<8x1xi32>
    %189 = vector.shape_cast %188 : vector<8x1xi1> to vector<8x1xi1>
    %190 = vector.broadcast %189 : vector<8x1xi1> to vector<8x32xi1>
    %191 = arith.select %190, %185, %142 : vector<8x32xi1>, vector<8x32xf32>
    %192 = vector.shape_cast %188 : vector<8x1xi1> to vector<8x1xi1>
    %193 = vector.broadcast %192 : vector<8x1xi1> to vector<8x32xi1>
    %194 = arith.select %193, %183, %145 : vector<8x32xi1>, vector<8x32xf32>
    %cst_47 = arith.constant 0.000000e+00 : f32
    %195 = vector.shape_cast %188 : vector<8x1xi1> to vector<8x1xi1>
    %196 = vector.broadcast %195 : vector<8x1xi1> to vector<8x32xi1>
    %197 = vector.broadcast %cst_47 : f32 to vector<8x32xf32>
    %198 = arith.select %196, %185, %197 : vector<8x32xi1>, vector<8x32xf32>
    %199 = arith.index_cast %c3_i32 : i32 to index
    %c0_48 = arith.constant 0 : index
    %c0_49 = arith.constant 0 : index
    %200 = vector.load %arg7[%199, %c0_48, %c0_49] : memref<8x8x32xf32, #tpu.memory_space<vmem>>, vector<1x8x32xf32>
    %201 = vector.shape_cast %200 : vector<1x8x32xf32> to vector<8x32xf32>
    %202 = vector.shape_cast %198 : vector<8x32xf32> to vector<1x8x32xf32>
    tpu.vector_store %arg7[%199, %c0_48, %c0_49], %202 {strides = array<i32>} : memref<8x8x32xf32, #tpu.memory_space<vmem>>, vector<1x8x32xf32>,
    %c4_i32 = arith.constant 4 : i32
    %203 = arith.index_cast %c4_i32 : i32 to index
    %c0_50 = arith.constant 0 : index
    %c0_51 = arith.constant 0 : index
    %204 = vector.load %arg3[%203, %c0_50, %c0_51] : memref<8x8x128xf32, #tpu.memory_space<vmem>>, vector<1x8x128xf32>
    %205 = vector.shape_cast %204 : vector<1x8x128xf32> to vector<8x128xf32>
    %206 = arith.truncf %191 : vector<8x32xf32> to vector<8x32xbf16>
    %c0_52 = arith.constant 0 : index
    %c0_53 = arith.constant 0 : index
    %207 = vector.load %arg4[%c0_52, %c0_53] : memref<32x128xbf16, #tpu.memory_space<vmem>>, vector<32x128xbf16>
    %cst_54 = arith.constant dense<0.000000e+00> : vector<8x128xf32>
    %208 = tpu.matmul %206, %207, %cst_54 {dimension_numbers = #tpu.dot_dimension_numbers<[1], [0], [0], [1], [0, 0, 1, 1], [], []>} : vector<8x32xbf16>, vector<32x128xbf16>, vector<8x128xf32> -> vector<8x128xf32>
    %209 = arith.addf %205, %208 : vector<8x128xf32>
    %210 = vector.extract_strided_slice %209 {offsets = [0, 0], sizes = [8, 32], strides = [1, 1]} : vector<8x128xf32> to vector<8x32xf32>
    %211 = arith.negf %210 : vector<8x32xf32>
    %212 = math.exp %211 : vector<8x32xf32>
    %cst_55 = arith.constant 1.000000e+00 : f32
    %213 = vector.broadcast %cst_55 : f32 to vector<8x32xf32>
    %214 = arith.addf %213, %212 : vector<8x32xf32>
    %215 = arith.divf %213, %214 : vector<8x32xf32>
    %216 = vector.extract_strided_slice %209 {offsets = [0, 32], sizes = [8, 32], strides = [1, 1]} : vector<8x128xf32> to vector<8x32xf32>
    %217 = arith.negf %216 : vector<8x32xf32>
    %218 = math.exp %217 : vector<8x32xf32>
    %cst_56 = arith.constant 1.000000e+00 : f32
    %219 = vector.broadcast %cst_56 : f32 to vector<8x32xf32>
    %220 = arith.addf %219, %218 : vector<8x32xf32>
    %221 = arith.divf %219, %220 : vector<8x32xf32>
    %222 = vector.extract_strided_slice %209 {offsets = [0, 64], sizes = [8, 32], strides = [1, 1]} : vector<8x128xf32> to vector<8x32xf32>
    %223 = math.tanh %222 : vector<8x32xf32>
    %224 = vector.extract_strided_slice %209 {offsets = [0, 96], sizes = [8, 32], strides = [1, 1]} : vector<8x128xf32> to vector<8x32xf32>
    %225 = arith.negf %224 : vector<8x32xf32>
    %226 = math.exp %225 : vector<8x32xf32>
    %cst_57 = arith.constant 1.000000e+00 : f32
    %227 = vector.broadcast %cst_57 : f32 to vector<8x32xf32>
    %228 = arith.addf %227, %226 : vector<8x32xf32>
    %229 = arith.divf %227, %228 : vector<8x32xf32>
    %230 = arith.mulf %221, %194 : vector<8x32xf32>
    %231 = arith.mulf %215, %223 : vector<8x32xf32>
    %232 = arith.addf %230, %231 : vector<8x32xf32>
    %233 = math.tanh %232 : vector<8x32xf32>
    %234 = arith.mulf %229, %233 : vector<8x32xf32>
    %235 = arith.addi %4, %c4_i32 : i32
    %236 = vector.broadcast %235 : i32 to vector<8x1xi32>
    %237 = arith.cmpi slt, %236, %3 : vector<8x1xi32>
    %238 = vector.shape_cast %237 : vector<8x1xi1> to vector<8x1xi1>
    %239 = vector.broadcast %238 : vector<8x1xi1> to vector<8x32xi1>
    %240 = arith.select %239, %234, %191 : vector<8x32xi1>, vector<8x32xf32>
    %241 = vector.shape_cast %237 : vector<8x1xi1> to vector<8x1xi1>
    %242 = vector.broadcast %241 : vector<8x1xi1> to vector<8x32xi1>
    %243 = arith.select %242, %232, %194 : vector<8x32xi1>, vector<8x32xf32>
    %cst_58 = arith.constant 0.000000e+00 : f32
    %244 = vector.shape_cast %237 : vector<8x1xi1> to vector<8x1xi1>
    %245 = vector.broadcast %244 : vector<8x1xi1> to vector<8x32xi1>
    %246 = vector.broadcast %cst_58 : f32 to vector<8x32xf32>
    %247 = arith.select %245, %234, %246 : vector<8x32xi1>, vector<8x32xf32>
    %248 = arith.index_cast %c4_i32 : i32 to index
    %c0_59 = arith.constant 0 : index
    %c0_60 = arith.constant 0 : index
    %249 = vector.load %arg7[%248, %c0_59, %c0_60] : memref<8x8x32xf32, #tpu.memory_space<vmem>>, vector<1x8x32xf32>
    %250 = vector.shape_cast %249 : vector<1x8x32xf32> to vector<8x32xf32>
    %251 = vector.shape_cast %247 : vector<8x32xf32> to vector<1x8x32xf32>
    tpu.vector_store %arg7[%248, %c0_59, %c0_60], %251 {strides = array<i32>} : memref<8x8x32xf32, #tpu.memory_space<vmem>>, vector<1x8x32xf32>,
    %c5_i32 = arith.constant 5 : i32
    %252 = arith.index_cast %c5_i32 : i32 to index
    %c0_61 = arith.constant 0 : index
    %c0_62 = arith.constant 0 : index
    %253 = vector.load %arg3[%252, %c0_61, %c0_62] : memref<8x8x128xf32, #tpu.memory_space<vmem>>, vector<1x8x128xf32>
    %254 = vector.shape_cast %253 : vector<1x8x128xf32> to vector<8x128xf32>
    %255 = arith.truncf %240 : vector<8x32xf32> to vector<8x32xbf16>
    %c0_63 = arith.constant 0 : index
    %c0_64 = arith.constant 0 : index
    %256 = vector.load %arg4[%c0_63, %c0_64] : memref<32x128xbf16, #tpu.memory_space<vmem>>, vector<32x128xbf16>
    %cst_65 = arith.constant dense<0.000000e+00> : vector<8x128xf32>
    %257 = tpu.matmul %255, %256, %cst_65 {dimension_numbers = #tpu.dot_dimension_numbers<[1], [0], [0], [1], [0, 0, 1, 1], [], []>} : vector<8x32xbf16>, vector<32x128xbf16>, vector<8x128xf32> -> vector<8x128xf32>
    %258 = arith.addf %254, %257 : vector<8x128xf32>
    %259 = vector.extract_strided_slice %258 {offsets = [0, 0], sizes = [8, 32], strides = [1, 1]} : vector<8x128xf32> to vector<8x32xf32>
    %260 = arith.negf %259 : vector<8x32xf32>
    %261 = math.exp %260 : vector<8x32xf32>
    %cst_66 = arith.constant 1.000000e+00 : f32
    %262 = vector.broadcast %cst_66 : f32 to vector<8x32xf32>
    %263 = arith.addf %262, %261 : vector<8x32xf32>
    %264 = arith.divf %262, %263 : vector<8x32xf32>
    %265 = vector.extract_strided_slice %258 {offsets = [0, 32], sizes = [8, 32], strides = [1, 1]} : vector<8x128xf32> to vector<8x32xf32>
    %266 = arith.negf %265 : vector<8x32xf32>
    %267 = math.exp %266 : vector<8x32xf32>
    %cst_67 = arith.constant 1.000000e+00 : f32
    %268 = vector.broadcast %cst_67 : f32 to vector<8x32xf32>
    %269 = arith.addf %268, %267 : vector<8x32xf32>
    %270 = arith.divf %268, %269 : vector<8x32xf32>
    %271 = vector.extract_strided_slice %258 {offsets = [0, 64], sizes = [8, 32], strides = [1, 1]} : vector<8x128xf32> to vector<8x32xf32>
    %272 = math.tanh %271 : vector<8x32xf32>
    %273 = vector.extract_strided_slice %258 {offsets = [0, 96], sizes = [8, 32], strides = [1, 1]} : vector<8x128xf32> to vector<8x32xf32>
    %274 = arith.negf %273 : vector<8x32xf32>
    %275 = math.exp %274 : vector<8x32xf32>
    %cst_68 = arith.constant 1.000000e+00 : f32
    %276 = vector.broadcast %cst_68 : f32 to vector<8x32xf32>
    %277 = arith.addf %276, %275 : vector<8x32xf32>
    %278 = arith.divf %276, %277 : vector<8x32xf32>
    %279 = arith.mulf %270, %243 : vector<8x32xf32>
    %280 = arith.mulf %264, %272 : vector<8x32xf32>
    %281 = arith.addf %279, %280 : vector<8x32xf32>
    %282 = math.tanh %281 : vector<8x32xf32>
    %283 = arith.mulf %278, %282 : vector<8x32xf32>
    %284 = arith.addi %4, %c5_i32 : i32
    %285 = vector.broadcast %284 : i32 to vector<8x1xi32>
    %286 = arith.cmpi slt, %285, %3 : vector<8x1xi32>
    %287 = vector.shape_cast %286 : vector<8x1xi1> to vector<8x1xi1>
    %288 = vector.broadcast %287 : vector<8x1xi1> to vector<8x32xi1>
    %289 = arith.select %288, %283, %240 : vector<8x32xi1>, vector<8x32xf32>
    %290 = vector.shape_cast %286 : vector<8x1xi1> to vector<8x1xi1>
    %291 = vector.broadcast %290 : vector<8x1xi1> to vector<8x32xi1>
    %292 = arith.select %291, %281, %243 : vector<8x32xi1>, vector<8x32xf32>
    %cst_69 = arith.constant 0.000000e+00 : f32
    %293 = vector.shape_cast %286 : vector<8x1xi1> to vector<8x1xi1>
    %294 = vector.broadcast %293 : vector<8x1xi1> to vector<8x32xi1>
    %295 = vector.broadcast %cst_69 : f32 to vector<8x32xf32>
    %296 = arith.select %294, %283, %295 : vector<8x32xi1>, vector<8x32xf32>
    %297 = arith.index_cast %c5_i32 : i32 to index
    %c0_70 = arith.constant 0 : index
    %c0_71 = arith.constant 0 : index
    %298 = vector.load %arg7[%297, %c0_70, %c0_71] : memref<8x8x32xf32, #tpu.memory_space<vmem>>, vector<1x8x32xf32>
    %299 = vector.shape_cast %298 : vector<1x8x32xf32> to vector<8x32xf32>
    %300 = vector.shape_cast %296 : vector<8x32xf32> to vector<1x8x32xf32>
    tpu.vector_store %arg7[%297, %c0_70, %c0_71], %300 {strides = array<i32>} : memref<8x8x32xf32, #tpu.memory_space<vmem>>, vector<1x8x32xf32>,
    %c6_i32 = arith.constant 6 : i32
    %301 = arith.index_cast %c6_i32 : i32 to index
    %c0_72 = arith.constant 0 : index
    %c0_73 = arith.constant 0 : index
    %302 = vector.load %arg3[%301, %c0_72, %c0_73] : memref<8x8x128xf32, #tpu.memory_space<vmem>>, vector<1x8x128xf32>
    %303 = vector.shape_cast %302 : vector<1x8x128xf32> to vector<8x128xf32>
    %304 = arith.truncf %289 : vector<8x32xf32> to vector<8x32xbf16>
    %c0_74 = arith.constant 0 : index
    %c0_75 = arith.constant 0 : index
    %305 = vector.load %arg4[%c0_74, %c0_75] : memref<32x128xbf16, #tpu.memory_space<vmem>>, vector<32x128xbf16>
    %cst_76 = arith.constant dense<0.000000e+00> : vector<8x128xf32>
    %306 = tpu.matmul %304, %305, %cst_76 {dimension_numbers = #tpu.dot_dimension_numbers<[1], [0], [0], [1], [0, 0, 1, 1], [], []>} : vector<8x32xbf16>, vector<32x128xbf16>, vector<8x128xf32> -> vector<8x128xf32>
    %307 = arith.addf %303, %306 : vector<8x128xf32>
    %308 = vector.extract_strided_slice %307 {offsets = [0, 0], sizes = [8, 32], strides = [1, 1]} : vector<8x128xf32> to vector<8x32xf32>
    %309 = arith.negf %308 : vector<8x32xf32>
    %310 = math.exp %309 : vector<8x32xf32>
    %cst_77 = arith.constant 1.000000e+00 : f32
    %311 = vector.broadcast %cst_77 : f32 to vector<8x32xf32>
    %312 = arith.addf %311, %310 : vector<8x32xf32>
    %313 = arith.divf %311, %312 : vector<8x32xf32>
    %314 = vector.extract_strided_slice %307 {offsets = [0, 32], sizes = [8, 32], strides = [1, 1]} : vector<8x128xf32> to vector<8x32xf32>
    %315 = arith.negf %314 : vector<8x32xf32>
    %316 = math.exp %315 : vector<8x32xf32>
    %cst_78 = arith.constant 1.000000e+00 : f32
    %317 = vector.broadcast %cst_78 : f32 to vector<8x32xf32>
    %318 = arith.addf %317, %316 : vector<8x32xf32>
    %319 = arith.divf %317, %318 : vector<8x32xf32>
    %320 = vector.extract_strided_slice %307 {offsets = [0, 64], sizes = [8, 32], strides = [1, 1]} : vector<8x128xf32> to vector<8x32xf32>
    %321 = math.tanh %320 : vector<8x32xf32>
    %322 = vector.extract_strided_slice %307 {offsets = [0, 96], sizes = [8, 32], strides = [1, 1]} : vector<8x128xf32> to vector<8x32xf32>
    %323 = arith.negf %322 : vector<8x32xf32>
    %324 = math.exp %323 : vector<8x32xf32>
    %cst_79 = arith.constant 1.000000e+00 : f32
    %325 = vector.broadcast %cst_79 : f32 to vector<8x32xf32>
    %326 = arith.addf %325, %324 : vector<8x32xf32>
    %327 = arith.divf %325, %326 : vector<8x32xf32>
    %328 = arith.mulf %319, %292 : vector<8x32xf32>
    %329 = arith.mulf %313, %321 : vector<8x32xf32>
    %330 = arith.addf %328, %329 : vector<8x32xf32>
    %331 = math.tanh %330 : vector<8x32xf32>
    %332 = arith.mulf %327, %331 : vector<8x32xf32>
    %333 = arith.addi %4, %c6_i32 : i32
    %334 = vector.broadcast %333 : i32 to vector<8x1xi32>
    %335 = arith.cmpi slt, %334, %3 : vector<8x1xi32>
    %336 = vector.shape_cast %335 : vector<8x1xi1> to vector<8x1xi1>
    %337 = vector.broadcast %336 : vector<8x1xi1> to vector<8x32xi1>
    %338 = arith.select %337, %332, %289 : vector<8x32xi1>, vector<8x32xf32>
    %339 = vector.shape_cast %335 : vector<8x1xi1> to vector<8x1xi1>
    %340 = vector.broadcast %339 : vector<8x1xi1> to vector<8x32xi1>
    %341 = arith.select %340, %330, %292 : vector<8x32xi1>, vector<8x32xf32>
    %cst_80 = arith.constant 0.000000e+00 : f32
    %342 = vector.shape_cast %335 : vector<8x1xi1> to vector<8x1xi1>
    %343 = vector.broadcast %342 : vector<8x1xi1> to vector<8x32xi1>
    %344 = vector.broadcast %cst_80 : f32 to vector<8x32xf32>
    %345 = arith.select %343, %332, %344 : vector<8x32xi1>, vector<8x32xf32>
    %346 = arith.index_cast %c6_i32 : i32 to index
    %c0_81 = arith.constant 0 : index
    %c0_82 = arith.constant 0 : index
    %347 = vector.load %arg7[%346, %c0_81, %c0_82] : memref<8x8x32xf32, #tpu.memory_space<vmem>>, vector<1x8x32xf32>
    %348 = vector.shape_cast %347 : vector<1x8x32xf32> to vector<8x32xf32>
    %349 = vector.shape_cast %345 : vector<8x32xf32> to vector<1x8x32xf32>
    tpu.vector_store %arg7[%346, %c0_81, %c0_82], %349 {strides = array<i32>} : memref<8x8x32xf32, #tpu.memory_space<vmem>>, vector<1x8x32xf32>,
    %c7_i32 = arith.constant 7 : i32
    %350 = arith.index_cast %c7_i32 : i32 to index
    %c0_83 = arith.constant 0 : index
    %c0_84 = arith.constant 0 : index
    %351 = vector.load %arg3[%350, %c0_83, %c0_84] : memref<8x8x128xf32, #tpu.memory_space<vmem>>, vector<1x8x128xf32>
    %352 = vector.shape_cast %351 : vector<1x8x128xf32> to vector<8x128xf32>
    %353 = arith.truncf %338 : vector<8x32xf32> to vector<8x32xbf16>
    %c0_85 = arith.constant 0 : index
    %c0_86 = arith.constant 0 : index
    %354 = vector.load %arg4[%c0_85, %c0_86] : memref<32x128xbf16, #tpu.memory_space<vmem>>, vector<32x128xbf16>
    %cst_87 = arith.constant dense<0.000000e+00> : vector<8x128xf32>
    %355 = tpu.matmul %353, %354, %cst_87 {dimension_numbers = #tpu.dot_dimension_numbers<[1], [0], [0], [1], [0, 0, 1, 1], [], []>} : vector<8x32xbf16>, vector<32x128xbf16>, vector<8x128xf32> -> vector<8x128xf32>
    %356 = arith.addf %352, %355 : vector<8x128xf32>
    %357 = vector.extract_strided_slice %356 {offsets = [0, 0], sizes = [8, 32], strides = [1, 1]} : vector<8x128xf32> to vector<8x32xf32>
    %358 = arith.negf %357 : vector<8x32xf32>
    %359 = math.exp %358 : vector<8x32xf32>
    %cst_88 = arith.constant 1.000000e+00 : f32
    %360 = vector.broadcast %cst_88 : f32 to vector<8x32xf32>
    %361 = arith.addf %360, %359 : vector<8x32xf32>
    %362 = arith.divf %360, %361 : vector<8x32xf32>
    %363 = vector.extract_strided_slice %356 {offsets = [0, 32], sizes = [8, 32], strides = [1, 1]} : vector<8x128xf32> to vector<8x32xf32>
    %364 = arith.negf %363 : vector<8x32xf32>
    %365 = math.exp %364 : vector<8x32xf32>
    %cst_89 = arith.constant 1.000000e+00 : f32
    %366 = vector.broadcast %cst_89 : f32 to vector<8x32xf32>
    %367 = arith.addf %366, %365 : vector<8x32xf32>
    %368 = arith.divf %366, %367 : vector<8x32xf32>
    %369 = vector.extract_strided_slice %356 {offsets = [0, 64], sizes = [8, 32], strides = [1, 1]} : vector<8x128xf32> to vector<8x32xf32>
    %370 = math.tanh %369 : vector<8x32xf32>
    %371 = vector.extract_strided_slice %356 {offsets = [0, 96], sizes = [8, 32], strides = [1, 1]} : vector<8x128xf32> to vector<8x32xf32>
    %372 = arith.negf %371 : vector<8x32xf32>
    %373 = math.exp %372 : vector<8x32xf32>
    %cst_90 = arith.constant 1.000000e+00 : f32
    %374 = vector.broadcast %cst_90 : f32 to vector<8x32xf32>
    %375 = arith.addf %374, %373 : vector<8x32xf32>
    %376 = arith.divf %374, %375 : vector<8x32xf32>
    %377 = arith.mulf %368, %341 : vector<8x32xf32>
    %378 = arith.mulf %362, %370 : vector<8x32xf32>
    %379 = arith.addf %377, %378 : vector<8x32xf32>
    %380 = math.tanh %379 : vector<8x32xf32>
    %381 = arith.mulf %376, %380 : vector<8x32xf32>
    %382 = arith.addi %4, %c7_i32 : i32
    %383 = vector.broadcast %382 : i32 to vector<8x1xi32>
    %384 = arith.cmpi slt, %383, %3 : vector<8x1xi32>
    %385 = vector.shape_cast %384 : vector<8x1xi1> to vector<8x1xi1>
    %386 = vector.broadcast %385 : vector<8x1xi1> to vector<8x32xi1>
    %387 = arith.select %386, %381, %338 : vector<8x32xi1>, vector<8x32xf32>
    %388 = vector.shape_cast %384 : vector<8x1xi1> to vector<8x1xi1>
    %389 = vector.broadcast %388 : vector<8x1xi1> to vector<8x32xi1>
    %390 = arith.select %389, %379, %341 : vector<8x32xi1>, vector<8x32xf32>
    %cst_91 = arith.constant 0.000000e+00 : f32
    %391 = vector.shape_cast %384 : vector<8x1xi1> to vector<8x1xi1>
    %392 = vector.broadcast %391 : vector<8x1xi1> to vector<8x32xi1>
    %393 = vector.broadcast %cst_91 : f32 to vector<8x32xf32>
    %394 = arith.select %392, %381, %393 : vector<8x32xi1>, vector<8x32xf32>
    %395 = arith.index_cast %c7_i32 : i32 to index
    %c0_92 = arith.constant 0 : index
    %c0_93 = arith.constant 0 : index
    %396 = vector.load %arg7[%395, %c0_92, %c0_93] : memref<8x8x32xf32, #tpu.memory_space<vmem>>, vector<1x8x32xf32>
    %397 = vector.shape_cast %396 : vector<1x8x32xf32> to vector<8x32xf32>
    %398 = vector.shape_cast %394 : vector<8x32xf32> to vector<1x8x32xf32>
    tpu.vector_store %arg7[%395, %c0_92, %c0_93], %398 {strides = array<i32>} : memref<8x8x32xf32, #tpu.memory_space<vmem>>, vector<1x8x32xf32>,
    %c8_i32_94 = arith.constant 8 : i32
    %c0_95 = arith.constant 0 : index
    %c0_96 = arith.constant 0 : index
    %399 = vector.load %arg10[%c0_95, %c0_96] : memref<8x32xf32, #tpu.memory_space<vmem>>, vector<8x32xf32>
    tpu.vector_store %arg10[%c0_95, %c0_96], %387 {strides = array<i32>} : memref<8x32xf32, #tpu.memory_space<vmem>>, vector<8x32xf32>,
    %c0_97 = arith.constant 0 : index
    %c0_98 = arith.constant 0 : index
    %400 = vector.load %arg11[%c0_97, %c0_98] : memref<8x32xf32, #tpu.memory_space<vmem>>, vector<8x32xf32>
    tpu.vector_store %arg11[%c0_97, %c0_98], %390 {strides = array<i32>} : memref<8x32xf32, #tpu.memory_space<vmem>>, vector<8x32xf32>,
    %c1_i32_99 = arith.constant 1 : i32
    %401 = arith.cmpi eq, %arg1, %c1_i32_99 : i32
    %402 = arith.extui %401 : i1 to i32
    %c0_i32_100 = arith.constant 0 : i32
    %403 = arith.cmpi ne, %402, %c0_i32_100 : i32
    scf.if %403 {
      %c0_101 = arith.constant 0 : index
      %c0_102 = arith.constant 0 : index
      %404 = vector.load %arg8[%c0_101, %c0_102] : memref<8x32xf32, #tpu.memory_space<vmem>>, vector<8x32xf32>
      tpu.vector_store %arg8[%c0_101, %c0_102], %387 {strides = array<i32>} : memref<8x32xf32, #tpu.memory_space<vmem>>, vector<8x32xf32>,
      %c0_103 = arith.constant 0 : index
      %c0_104 = arith.constant 0 : index
      %405 = vector.load %arg9[%c0_103, %c0_104] : memref<8x32xf32, #tpu.memory_space<vmem>>, vector<8x32xf32>
      tpu.vector_store %arg9[%c0_103, %c0_104], %390 {strides = array<i32>} : memref<8x32xf32, #tpu.memory_space<vmem>>, vector<8x32xf32>,
    } else {
    }
    return
  }
  func.func @transform_0(%arg0: i32, %arg1: i32) -> (i32, i32) {
    %c0_i32 = arith.constant 0 : i32
    %c0_i32_0 = arith.constant 0 : i32
    return %arg0, %c0_i32 : i32, i32
  }
  func.func @transform_1(%arg0: i32, %arg1: i32) -> (i32, i32, i32) {
    %c0_i32 = arith.constant 0 : i32
    %c0_i32_0 = arith.constant 0 : i32
    return %arg1, %arg0, %c0_i32 : i32, i32, i32
  }
  func.func @transform_2(%arg0: i32, %arg1: i32) -> (i32, i32) {
    %c0_i32 = arith.constant 0 : i32
    %c0_i32_0 = arith.constant 0 : i32
    %c0_i32_1 = arith.constant 0 : i32
    return %c0_i32, %c0_i32_0 : i32, i32
  }
  func.func @transform_3(%arg0: i32, %arg1: i32) -> (i32, i32) {
    %c0_i32 = arith.constant 0 : i32
    %c0_i32_0 = arith.constant 0 : i32
    return %arg0, %c0_i32 : i32, i32
  }
  func.func @transform_4(%arg0: i32, %arg1: i32) -> (i32, i32) {
    %c0_i32 = arith.constant 0 : i32
    %c0_i32_0 = arith.constant 0 : i32
    return %arg0, %c0_i32 : i32, i32
  }
  func.func @transform_5(%arg0: i32, %arg1: i32) -> (i32, i32, i32) {
    %c0_i32 = arith.constant 0 : i32
    %c0_i32_0 = arith.constant 0 : i32
    return %arg1, %arg0, %c0_i32 : i32, i32, i32
  }
  func.func @transform_6(%arg0: i32, %arg1: i32) -> (i32, i32) {
    %c0_i32 = arith.constant 0 : i32
    %c0_i32_0 = arith.constant 0 : i32
    return %arg0, %c0_i32 : i32, i32
  }
  func.func @transform_7(%arg0: i32, %arg1: i32) -> (i32, i32) {
    %c0_i32 = arith.constant 0 : i32
    %c0_i32_0 = arith.constant 0 : i32
    return %arg0, %c0_i32 : i32, i32
  }
}

</mosaic_0001>

<bundles_post_ra>
// kernel: tpu_custom_call.1
= control target key start
LH: loop header
LB: loop body
LE: loop exit
PB: predicated region body
PF: predicated region fallthrough
CT: control target
= control target key end

     0   :  { %s2376_s0 = inlined_call_operand.vmem [shape: s32[8,1], index: 0, kind: input, shape index: {}]   ;;  %s2377_s1 = inlined_call_operand.hbm [shape: f32[16,8,128], index: 1, kind: input, shape index: {}]   ;;  %s2378_s2 = inlined_call_operand.hbm [shape: bf16[32,128], index: 2, kind: input, shape index: {}]   ;;  %s2379_s3 = inlined_call_operand.vmem [shape: f32[8,32], index: 3, kind: input, shape index: {}]   ;;  %s2380_s4 = inlined_call_operand.hbm [shape: f32[8,32], index: 4, kind: input, shape index: {}]   ;;  %s2381_s5 = inlined_call_operand.hbm [shape: f32[16,8,32], index: 5, kind: output, shape index: {0}]   ;;  %s2382_s6 = inlined_call_operand.hbm [shape: f32[8,32], index: 6, kind: output, shape index: {1}]   ;;  %s2383_s7 = inlined_call_operand.hbm [shape: f32[8,32], index: 7, kind: output, shape index: {2}]  }
   0x1   :  { %2387 = sst [smem:[#allocation21_spill]] %s2378_s2 }
   0x2   :  { %2388 = sst [smem:[#allocation22_spill]] %s2380_s4 }
   0x3   :  { %2389 = sst [smem:[#allocation23_spill]] %s2383_s7 }
   0x4   :  { %13 = vsyncpa [#allocation5], 0 }
   0x5   :  { %15 = vsyncpa [#allocation5 + $0x1], 0 }
   0x6   :  { %16 = vsyncpa [#allocation8], 0 }
   0x7   :  { %17 = vsyncpa [#allocation6], 0 }
   0x8   :  { %19 = vsyncpa [#allocation6 + $0x1], 0 }
   0x9   :  { %20 = vsyncpa [#allocation12], 0  ;;  %s1987_s24 = smov 0   ;;  %s1989_s25 = smov 0  }
   0xa   :  { %s1991_s26 = smov 0   ;;  %s1993_s27 = smov 0  }
   0xb   :  { %s1995_s28 = smov 0   ;;  %s1997_s29 = smov 0  }
   0xc LB: > { %2390 = sst [smem:[#allocation18_spill]] %s1911_s24  ;;  %s1381_s30 = sadd.s32 4294967295, %s1931_s29   ;;  %s1931_s29 = sphi %s1997_s29, %s26_s29   ;;  %s1927_s28 = sphi %s1995_s28, %s2410_s28   ;;  %s1923_s27 = sphi %s1993_s27, %s2409_s27   ;;  %s1919_s26 = sphi %s1991_s26, %s2408_s26   ;;  %s1915_s25 = sphi %s1989_s25, %s2407_s25   ;;  %s1911_s24 = sphi %s1987_s24, %s2406_s24  }
   0xd   : > { %s1382_s8 = sadd.s32 4294967294, %s1931_s29   ;;  %p86_p0 = scmp.ne.s32.totalorder %s1915_s25, %s1911_s24 }
   0xe   : > { %p2021_p1 = scmp.eq.s32.totalorder %s1381_s30, 0  ;;  %p2025_p2 = scmp.eq.s32.totalorder %s1381_s30, 1 }
   0xf   : > { %p191_p3 = scmp.eq.s32.totalorder %s1382_s8, 1  ;;  %p1383_p5 = scmp.ge.s32.totalorder %s1931_s29, 1 }
  0x10   : > { %p2031_p4 = por %p2021_p1, %p86_p0  ;;  %p250_p7 = scmp.lt.s32.totalorder %s1931_s29, 3 }
  0x11   : > { %p2036_p6 = por %p191_p3, %p86_p0  ;;  %s2396_s2 = sld [smem:[#allocation21_spill]] }
  0x12   : > { %p2044_p8 = pnand %p1383_p5, %p250_p7  ;;  %s1933_s17 = smov [#allocation7]  }
  0x13   : > { %s2394_s12 = scalar_select %p2036_p6, 1, 0 }
  0x14   : > { %p1541_p9 = pneg %p2044_p8  ;;  %s270_s18 = sshll.u32 %s1933_s17, 4  ;;  %s271_s18 = int_to_ptr.vmem [resolvable:$true] %s270_s18 }
  0x15   : > { %2395 = sst [smem:[#allocation19_spill]] %s2394_s12  ;;  %p1388_p11 = scmp.ge.s32.totalorder %s1931_s29, 2 }
  0x16   : > { %p1542_p10 = pnand %p1541_p9, %p2021_p1  ;;  %s2398_s4 = sld [smem:[#allocation22_spill]] }
  0x17   : > { %s268_s15 = sshll.u32 %s2396_s2, 4  ;;  %s1934_s22 = smov 64   ;;  %s269_s15 = int_to_ptr.hbm [resolvable:$true] %s268_s15 }
  0x18   : > { %s1935_s23 = smov 4   ;;  %s1936_s30 = smov [#allocation9]  }
  0x19   : > { %1544 = dma.hbm_to_vmem [thread:$0]  (!%p1542_p10), %s269_s15, 256, %s271_s18, [#allocation8], %s1934_s22, %s1934_s22, %s1935_s23  }
  0x1a   : > { %s294_s8 = sshll.u32 %s1936_s30, 4  ;;  %s35_s13 = sadd.s32 1, %s1927_s28  ;;  %s295_s8 = int_to_ptr.vmem [resolvable:$true] %s294_s8 }
  0x1b   : > { %s73_s14 = sadd.s32 1, %s1919_s26  ;;  %p36_p12 = scmp.ge.s32.totalorder %s35_s13, 2 }
  0x1c   : > { %s292_s21 = sshll.u32 %s2398_s4, 4  ;;  %p80_p13 = scmp.ne.s32.totalorder %s1919_s26, %s1915_s25  ;;  %s293_s21 = int_to_ptr.hbm [resolvable:$true] %s292_s21 }
  0x1d   : > { %1547 = dma.hbm_to_vmem [thread:$0]  (!%p1542_p10), %s293_s21, 128, %s295_s8, [#allocation8]  }
  0x1e   : > { %p81_p0 = scmp.eq.s32.totalorder %s1931_s29, 0  ;;  %p1558_p3 = scmp.lt.s32.totalorder %s1931_s29, 2 }
  0x1f   : > { %s2412_s13 = smov (%p36_p12, %s35_s13), 0  ;;  %p2070_p7 = por %p2025_p2, %p80_p13 }
  0x20   : > { %2399 = sst [smem:[#allocation20_spill]] %s2412_s13  ;;  %p2064_p5 = por %p81_p0, %p80_p13 }
  0x21   : > { %s68_s18 = ssub.s32 %s1927_s28, %s2412_s13  ;;  %s305_s19 = sand.u32 1, %s1919_s26  }
  0x22   : > { %p71_p9 = scmp.eq.s32.totalorder %s68_s18, 0  ;;  %s1389_s20 = sshll.u32 %s305_s19, 6 }
  0x23   : > { %s1503_s21 = sshll.u32 %s1927_s28, 6  ;;  %s309_s4 = scalar_lea.vmem [#allocation4], %s1389_s20 }
  0x24   : > { %s2079_s22 = scalar_select %p71_p9, %s1919_s26, %s73_s14  }
  0x25   : > { %s315_s8 = scalar_lea.hbm %s2377_s1, %s1503_s21  ;;  %s318_s12 = sshll.u32 %s309_s4, 4  ;;  %s319_s12 = int_to_ptr.vmem [resolvable:$true] %s318_s12 }
  0x26   : > { %s316_s2 = sshll.u32 %s315_s8, 4  ;;  %p1549_p10 = pnand %p1558_p3, %p2064_p5  ;;  %s317_s2 = int_to_ptr.hbm [resolvable:$true] %s316_s2 }
  0x27   : > { %s306_s24 = scalar_lea.sflag [#allocation5], %s305_s19  ;;  %s1937_s13 = smov 128  }
  0x28   : > { %s1938_s7 = smov 8   ;;  %330 = sbr.rel (%p2044_p8) target bundleno = 4767 (0x129f), region = 40 }
  0x29   : > { %1551 = dma.hbm_to_vmem [thread:$0]  (!%p1549_p10), %s317_s2, 1024, %s319_s12, %s306_s24, %s1937_s13, %s1937_s13, %s1938_s7  }
  0x2a   : > { %s2091_s14 = sand.u32 (!%p2044_p8), 1, %s1915_s25  }
  0x2b   : > { %s1393_s18 = sshll.u32 (!%p2044_p8), %s2091_s14, 6  ;;  %s333_s4 = scalar_lea.sflag (!%p2044_p8), [#allocation5], %s2091_s14 }
  0x2c   : > { %s2095_s20 = scalar_lea.vmem (!%p2044_p8), [#allocation4], %s1393_s18 }
  0x2d   : > { %1894 = dma.done.wait (%p2031_p4), %s333_s4, 1024  }
  0x2e   : > { %1896 = vsyncadd (%p2031_p4), %s333_s4, 4294966272 }
  0x2f   : > { %1898 = dma.done.wait (%p2021_p1), [#allocation8], 384  }
  0x30   : > { %1900 = vsyncadd (%p2021_p1), [#allocation8], 4294966912  ;;  %s2105_s2 = scalar_lea.vmem [#allocation10], %s1393_s18  ;;  %p1397_p8 = scmp.ne.s32.totalorder %s1923_s27, 0 }
  0x32   : > { %400 = sbr.rel (%p1397_p8) target bundleno = 58 (0x3a), region = 56 }
  0x37   : > { %v401_v0 = vld [vmem:[%s2379_s3] sm:$0xff]  ;;  %vm402_vm0 = vcmask 261120  }
  0x38   : > { %v404_v1 = vld [vmem:[#allocation9] sm:$0xff]  ;;  %403 = vst.msk [vmem:[#allocation2] sm:$0xff] %vm402_vm0, %v401_v0 }
  0x39   : > { %405 = vst.msk [vmem:[#allocation3] sm:$0xff] %vm402_vm0, %v404_v1 }
  0x3a PF: > { %v1505_v2 = vld [vmem:[#allocation7 + $0x8] sm:$0xff]  ;;  %v1504_v3 = vld [vmem:[#allocation7] sm:$0xff]  ;;  %vm428_vm1 = vcmask 261120   ;;  %s1939_s9 = smov 64   ;;  %s1940_s11 = smov 32   ;;  %v2121_v15 = vld [vmem:[%s2376_s0] sm:$0xff] }
  0x3b   : > { %438 = vmatpush.bf16.msra.mxu0 %v1505_v2  ;;  %v410_v6 = vld [vmem:[%s2095_s20] sm:$0xff]  ;;  %s2116_s12 = sshll.u32 %s1923_s27, 3  ;;  %v1941_v18 = vmov 0   ;;  %s1942_s17 = smov 96   ;;  %v1507_v36 = vld [vmem:[#allocation7 + $0x8] sm:$0xff] }
  0x3c   : > { %v487_v16 = vstv %s2116_s12  ;;  %1628 = vset.pattern.permute.xlu2 %v1941_v18  ;;  %1629 = vset.pattern.permute.xlu1 %v1941_v18  ;;  %v1506_v37 = vld [vmem:[#allocation7] sm:$0xff]  ;;  %v1409_v45 = vld [vmem:[%s2095_s20 + $0x8] sm:$0xff]  ;;  %s582_s19 = sadd.s32 1, %s2116_s12  ;;  %s675_s21 = sadd.s32 2, %s2116_s12 }
  0x3d   : > { %vm488_vm2 = vcmp.lt.s32.totalorder %v487_v16, %v2121_v15  ;;  %1630 = vset.pattern.permute.xlu0 %v1941_v18  ;;  %537 = vmatpush.bf16.msra.mxu1 %v1507_v36  ;;  %v583_v50 = vstv %s582_s19  ;;  %s768_s23 = sadd.s32 3, %s2116_s12  ;;  %s861_s30 = sadd.s32 4, %s2116_s12 }
  0x3e   : > { %v489_v19 = vsel %vm488_vm2, 1, %v1941_v18  ;;  %vm584_vm8 = vcmp.lt.s32.totalorder %v583_v50, %v2121_v15  ;;  %v1510_v50 = vld [vmem:[#allocation7] sm:$0xff]  ;;  %s954_s8 = sadd.s32 5, %s2116_s12  ;;  %s1047_s18 = sadd.s32 6, %s2116_s12 }
  0x3f   : > { %v408_v4 = vld [vmem:[#allocation2] sm:$0xff]  ;;  %439 = vmatpush.bf16.msra.mxu0 %v1504_v3  ;;  %491 = vperm.xlu2 %1628, %v489_v19   ;;  %v585_v51 = vsel %vm584_vm8, 1, %v1941_v18  ;;  %s1140_s4 = sadd.s32 7, %s2116_s12  ;;  %p1493_p1 = scmp.ne.s32.totalorder %s1923_s27, 1 }
  0x40   : > { %v411_v5 = vpack.c.bf16 %v408_v4, %v408_v4  ;;  %v409_v11 = vld [vmem:[#allocation3] sm:$0xff] }
  0x41   : > { %538 = vmatpush.bf16.msra.mxu1 %v1506_v37 }
  0x42   : > { %1407 = vmatmul.msk.bf16.vlgmr.msra.gmra.mxu0 %vm428_vm1, %v411_v5 }
  0x47   : > { %495 = vrot.lane.b32.xlu2 %v408_v4, %s1942_s17 }
  0x99   : > { %v2132_v38 = vpop.permute.xlu2 %491 }
  0x9a   : > { %vm493_vm7 = vcmp.eq.s32.totalorder %v2132_v38, 1 }
  0xa1   : > { %v496_v40 = vpop.permute.xlu2 %495 }
  0xbf   : > { %v441_v7 = vpop.f32.mrf.mxu0 }
  0xc0   : > { %v445_v8 = vadd.f32 %v441_v7, %v410_v6 }
  0xc2   : > { %1631 = vtanh.f32 %v445_v8  ;;  %v1408_v12 = vmul.f32 -1.442695, %v445_v8  ;;  %v1509_v8 = vld [vmem:[#allocation7 + $0x8] sm:$0xff] }
  0xc3   : > { %630 = vmatpush.bf16.msra.mxu2 %v1509_v8 }
  0xc4   : > { %1633 = vpow2.f32 %v1408_v12 }
  0xc7   : > { %v443_v9 = vpop.f32.mrf.mxu0 }
  0xc8   : > { %v1632_v10 = vpop.eup %1631  ;;  %v1508_v9 = vld [vmem:[#allocation7] sm:$0xff] }
  0xc9   : > { %472 = vrot.lane.b32.xlu0 %v1632_v10, %s1939_s9  ;;  %631 = vmatpush.bf16.msra.mxu2 %v1508_v9 }
  0xca   : > { %v1634_v13 = vpop.eup %1633 }
  0xcb   : > { %v449_v14 = vadd.f32 1.0, %v1634_v13 }
  0xcd   : > { %1635 = vrcp.f32 %v449_v14  ;;  %v461_v24 = vand.u32 2147483648, %v449_v14  ;;  %vm455_vm4 = vweird.f32 %v449_v14  ;;  %v459_v25 = vand.u32 2147483647, %v449_v14 }
  0xcf   : > { %v462_v27 = vor.u32 1.1754944e-38, %v461_v24  ;;  %vm460_vm6 = vcmp.eq.f32.partialorder %v459_v25, 8.507059e+37 }
  0xd1   : > { %467 = vrot.lane.b32.xlu0 %v409_v11, %s1940_s11 }
  0xd3   : > { %v1636_v17 = vpop.eup %1635 }
  0xd4   : > { %v451_v20 = vmul.f32 %v1636_v17, %v449_v14  ;;  %vm456_vm3 = vweird.f32 %v1636_v17 }
  0xd5   : > { %vm457_vm5 = vmor %vm455_vm4, %vm456_vm3 }
  0xd6   : > { %v452_v21 = vsub.f32 1.0, %v451_v20 }
  0xd8   : > { %v453_v22 = vmul.f32 %v1636_v17, %v452_v21 }
  0xda   : > { %v454_v23 = vadd.f32 %v1636_v17, %v453_v22 }
  0xdc   : > { %v458_v26 = vsel %vm457_vm5, %v1636_v17, %v454_v23  ;;  %v1421_v17 = vld [vmem:[%s2095_s20 + $0x10] sm:$0xff] }
  0xdd   : > { %v463_v29 = vsel %vm460_vm6, %v462_v27, %v458_v26  ;;  %v676_v26 = vstv %s675_s21 }
  0xde   : > { %vm677_vm14 = vcmp.lt.s32.totalorder %v676_v26, %v2121_v15 }
  0xdf   : > { %v678_v27 = vsel %vm677_vm14, 1, %v1941_v18 }
 0x13b   : > { %v473_v28 = vpop.permute.xlu0 %472 }
 0x13c   : > { %v475_v30 = vmul.f32 %v473_v28, %v463_v29  ;;  %v769_v28 = vstv %s768_s23 }
 0x13d   : > { %vm770_vm15 = vcmp.lt.s32.totalorder %v769_v28, %v2121_v15 }
 0x13e   : > { %477 = vrot.lane.b32.xlu1 %v475_v30, %s1940_s11 }
 0x143   : > { %v468_v31 = vpop.permute.xlu0 %467 }
 0x144   : > { %v470_v32 = vmul.f32 %v468_v31, %v463_v29 }
 0x1b0   : > { %v478_v33 = vpop.permute.xlu1 %477 }
 0x1b1   : > { %v480_v34 = vadd.f32 %v478_v33, %v470_v32 }
 0x1b3   : > { %1637 = vtanh.f32 %v480_v34  ;;  %v499_v3 = vsel %vm493_vm7, %v480_v34, %v468_v31 }
 0x1b9   : > { %v1638_v35 = vpop.eup %1637 }
 0x1ba   : > { %483 = vrot.lane.b32.xlu1 %v1638_v35, %s1939_s9 }
 0x22c   : > { %v484_v39 = vpop.permute.xlu1 %483 }
 0x22d   : > { %v2134_v41 = vmul.f32 %v484_v39, %v463_v29  ;;  %v771_v29 = vsel %vm770_vm15, 1, %v1941_v18 }
 0x22f   : > { %v498_v42 = vsel %vm493_vm7, %v2134_v41, %v496_v40 }
 0x230   : > { %v508_v43 = vpack.c.bf16 %v498_v42, %v498_v42 }
 0x232   : > { %514 = vrot.lane.b32.xlu0 %v508_v43, %s1940_s11 }
 0x2a4   : > { %v515_v44 = vpop.permute.xlu0 %514 }
 0x2a5   : > { %1418 = vmatmul.msk.bf16.vlgmr.msra.gmra.mxu1 %vm428_vm1, %v515_v44 }
 0x322   : > { %v540_v46 = vpop.f32.mrf.mxu1 }
 0x323   : > { %v544_v47 = vadd.f32 %v1409_v45, %v540_v46 }
 0x325   : > { %1639 = vtanh.f32 %v544_v47  ;;  %v1419_v52 = vmul.f32 -1.442695, %v544_v47 }
 0x327   : > { %1641 = vpow2.f32 %v1419_v52 }
 0x32a   : > { %v542_v48 = vpop.f32.mrf.mxu1 }
 0x32b   : > { %v1640_v49 = vpop.eup %1639 }
 0x32c   : > { %567 = vrot.lane.b32.xlu1 %v1640_v49, %s1939_s9  ;;  %v1511_v49 = vld [vmem:[#allocation7 + $0x8] sm:$0xff] }
 0x32d   : > { %v1642_v53 = vpop.eup %1641  ;;  %723 = vmatpush.bf16.msra.mxu3 %v1511_v49 }
 0x32e   : > { %v548_v54 = vadd.f32 1.0, %v1642_v53 }
 0x330   : > { %1643 = vrcp.f32 %v548_v54  ;;  %v560_v60 = vand.u32 2147483648, %v548_v54  ;;  %vm554_vm10 = vweird.f32 %v548_v54  ;;  %v558_v61 = vand.u32 2147483647, %v548_v54 }
 0x331   : > { %724 = vmatpush.bf16.msra.mxu3 %v1510_v50 }
 0x332   : > { %v561_v63 = vor.u32 1.1754944e-38, %v560_v60  ;;  %vm559_vm12 = vcmp.eq.f32.partialorder %v558_v61, 8.507059e+37 }
 0x334   : > { %587 = vperm.xlu1 %1629, %v585_v51  }
 0x336   : > { %v1644_v55 = vpop.eup %1643 }
 0x337   : > { %v550_v56 = vmul.f32 %v1644_v55, %v548_v54  ;;  %vm555_vm9 = vweird.f32 %v1644_v55 }
 0x338   : > { %vm556_vm11 = vmor %vm554_vm10, %vm555_vm9 }
 0x339   : > { %v551_v57 = vsub.f32 1.0, %v550_v56 }
 0x33b   : > { %v552_v58 = vmul.f32 %v1644_v55, %v551_v57  ;;  %v1433_v57 = vld [vmem:[%s2095_s20 + $0x18] sm:$0xff] }
 0x33d   : > { %v553_v59 = vadd.f32 %v1644_v55, %v552_v58 }
 0x33f   : > { %v557_v62 = vsel %vm556_vm11, %v1644_v55, %v553_v59 }
 0x340   : > { %v562_v1 = vsel %vm559_vm12, %v561_v63, %v557_v62 }
 0x341   : > { %v565_v4 = vmul.f32 %v562_v1, %v499_v3 }
 0x39e   : > { %v568_v0 = vpop.permute.xlu1 %567 }
 0x39f   : > { %v570_v2 = vmul.f32 %v568_v0, %v562_v1 }
 0x3a1   : > { %572 = vrot.lane.b32.xlu2 %v570_v2, %s1940_s11 }
 0x3a6   : > { %v2151_v10 = vpop.permute.xlu1 %587 }
 0x3a7   : > { %vm589_vm13 = vcmp.eq.s32.totalorder %v2151_v10, 1 }
 0x3fb   : > { %v573_v5 = vpop.permute.xlu2 %572 }
 0x3fc   : > { %v575_v6 = vadd.f32 %v573_v5, %v565_v4 }
 0x3fe   : > { %1645 = vtanh.f32 %v575_v6  ;;  %v591_v44 = vsel %vm589_vm13, %v575_v6, %v499_v3 }
 0x404   : > { %v1646_v7 = vpop.eup %1645 }
 0x405   : > { %578 = vrot.lane.b32.xlu0 %v1646_v7, %s1939_s9 }
 0x477   : > { %v579_v11 = vpop.permute.xlu0 %578 }
 0x478   : > { %v2153_v12 = vmul.f32 %v579_v11, %v562_v1 }
 0x47a   : > { %v590_v13 = vsel %vm589_vm13, %v2153_v12, %v498_v42 }
 0x47b   : > { %v601_v14 = vpack.c.bf16 %v590_v13, %v590_v13 }
 0x47d   : > { %607 = vrot.lane.b32.xlu2 %v601_v14, %s1940_s11 }
 0x4d7   : > { %v608_v16 = vpop.permute.xlu2 %607 }
 0x4d8   : > { %1430 = vmatmul.msk.bf16.vlgmr.msra.gmra.mxu2 %vm428_vm1, %v608_v16 }
 0x55b   : > { %v633_v19 = vpop.f32.mrf.mxu2 }
 0x55c   : > { %v637_v20 = vadd.f32 %v1421_v17, %v633_v19 }
 0x55e   : > { %1647 = vtanh.f32 %v637_v20  ;;  %v1431_v23 = vmul.f32 -1.442695, %v637_v20 }
 0x560   : > { %1649 = vpow2.f32 %v1431_v23  ;;  %v1512_v23 = vld [vmem:[#allocation7] sm:$0xff] }
 0x563   : > { %v635_v21 = vpop.f32.mrf.mxu2 }
 0x564   : > { %v1648_v22 = vpop.eup %1647 }
 0x565   : > { %660 = vrot.lane.b32.xlu0 %v1648_v22, %s1939_s9  ;;  %v1513_v22 = vld [vmem:[#allocation7 + $0x8] sm:$0xff] }
 0x566   : > { %v1650_v24 = vpop.eup %1649  ;;  %816 = vmatpush.bf16.msrb.mxu0 %v1513_v22 }
 0x567   : > { %v641_v25 = vadd.f32 1.0, %v1650_v24 }
 0x569   : > { %1651 = vrcp.f32 %v641_v25  ;;  %v653_v35 = vand.u32 2147483648, %v641_v25  ;;  %vm647_vm2 = vweird.f32 %v641_v25  ;;  %v651_v36 = vand.u32 2147483647, %v641_v25 }
 0x56a   : > { %817 = vmatpush.bf16.msrb.mxu0 %v1512_v23 }
 0x56b   : > { %v654_v39 = vor.u32 1.1754944e-38, %v653_v35  ;;  %vm652_vm4 = vcmp.eq.f32.partialorder %v651_v36, 8.507059e+37  ;;  %v862_v35 = vstv %s861_s30 }
 0x56c   : > { %vm863_vm12 = vcmp.lt.s32.totalorder %v862_v35, %v2121_v15 }
 0x56d   : > { %680 = vperm.xlu0 %1630, %v678_v27   ;;  %v864_v36 = vsel %vm863_vm12, 1, %v1941_v18 }
 0x56f   : > { %v1652_v30 = vpop.eup %1651 }
 0x570   : > { %v643_v31 = vmul.f32 %v1652_v30, %v641_v25  ;;  %vm648_vm0 = vweird.f32 %v1652_v30 }
 0x571   : > { %vm649_vm3 = vmor %vm647_vm2, %vm648_vm0 }
 0x572   : > { %v644_v32 = vsub.f32 1.0, %v643_v31 }
 0x574   : > { %v645_v33 = vmul.f32 %v1652_v30, %v644_v32 }
 0x575   : > { %773 = vperm.xlu0 %1630, %v771_v29  }
 0x576   : > { %v646_v34 = vadd.f32 %v1652_v30, %v645_v33 }
 0x578   : > { %v650_v37 = vsel %vm649_vm3, %v1652_v30, %v646_v34  ;;  %v1445_v30 = vld [vmem:[%s2095_s20 + $0x20] sm:$0xff] }
 0x579   : > { %v655_v42 = vsel %vm652_vm4, %v654_v39, %v650_v37 }
 0x57a   : > { %v658_v45 = vmul.f32 %v655_v42, %v591_v44 }
 0x5d7   : > { %v661_v40 = vpop.permute.xlu0 %660 }
 0x5d8   : > { %v663_v43 = vmul.f32 %v661_v40, %v655_v42 }
 0x5da   : > { %665 = vrot.lane.b32.xlu1 %v663_v43, %s1940_s11 }
 0x5df   : > { %v2173_v51 = vpop.permute.xlu0 %680 }
 0x5e0   : > { %vm682_vm5 = vcmp.eq.s32.totalorder %v2173_v51, 1 }
 0x5e7   : > { %v2189_v24 = vpop.permute.xlu0 %773 }
 0x5e8   : > { %vm775_vm11 = vcmp.eq.s32.totalorder %v2189_v24, 1 }
 0x64c   : > { %v666_v46 = vpop.permute.xlu1 %665 }
 0x64d   : > { %v668_v47 = vadd.f32 %v666_v46, %v658_v45 }
 0x64f   : > { %1653 = vtanh.f32 %v668_v47  ;;  %v684_v16 = vsel %vm682_vm5, %v668_v47, %v591_v44 }
 0x655   : > { %v1654_v48 = vpop.eup %1653 }
 0x656   : > { %671 = vrot.lane.b32.xlu2 %v1654_v48, %s1939_s9 }
 0x6b0   : > { %v672_v52 = vpop.permute.xlu2 %671 }
 0x6b1   : > { %v2175_v53 = vmul.f32 %v672_v52, %v655_v42 }
 0x6b3   : > { %v683_v54 = vsel %vm682_vm5, %v2175_v53, %v590_v13 }
 0x6b4   : > { %v694_v55 = vpack.c.bf16 %v683_v54, %v683_v54 }
 0x6b6   : > { %700 = vrot.lane.b32.xlu1 %v694_v55, %s1940_s11 }
 0x728   : > { %v701_v56 = vpop.permute.xlu1 %700 }
 0x729   : > { %1442 = vmatmul.msk.bf16.vlgmr.msra.gmra.mxu3 %vm428_vm1, %v701_v56 }
 0x7ac   : > { %v726_v58 = vpop.f32.mrf.mxu3 }
 0x7ad   : > { %v730_v59 = vadd.f32 %v1433_v57, %v726_v58 }
 0x7af   : > { %1655 = vtanh.f32 %v730_v59  ;;  %v1443_v62 = vmul.f32 -1.442695, %v730_v59 }
 0x7b1   : > { %1657 = vpow2.f32 %v1443_v62  ;;  %v1514_v62 = vld [vmem:[#allocation7] sm:$0xff] }
 0x7b4   : > { %v728_v60 = vpop.f32.mrf.mxu3 }
 0x7b5   : > { %v1656_v61 = vpop.eup %1655 }
 0x7b6   : > { %753 = vrot.lane.b32.xlu2 %v1656_v61, %s1939_s9  ;;  %v1515_v61 = vld [vmem:[#allocation7 + $0x8] sm:$0xff] }
 0x7b7   : > { %v1658_v63 = vpop.eup %1657  ;;  %909 = vmatpush.bf16.msrb.mxu1 %v1515_v61 }
 0x7b8   : > { %v734_v0 = vadd.f32 1.0, %v1658_v63 }
 0x7ba   : > { %1659 = vrcp.f32 %v734_v0  ;;  %v746_v6 = vand.u32 2147483648, %v734_v0  ;;  %vm740_vm8 = vweird.f32 %v734_v0  ;;  %v744_v7 = vand.u32 2147483647, %v734_v0 }
 0x7bb   : > { %910 = vmatpush.bf16.msrb.mxu1 %v1514_v62 }
 0x7bc   : > { %v747_v9 = vor.u32 1.1754944e-38, %v746_v6  ;;  %vm745_vm10 = vcmp.eq.f32.partialorder %v744_v7, 8.507059e+37 }
 0x7c0   : > { %v1660_v1 = vpop.eup %1659 }
 0x7c1   : > { %v736_v2 = vmul.f32 %v1660_v1, %v734_v0  ;;  %vm741_vm6 = vweird.f32 %v1660_v1 }
 0x7c2   : > { %vm742_vm9 = vmor %vm740_vm8, %vm741_vm6 }
 0x7c3   : > { %v737_v3 = vsub.f32 1.0, %v736_v2 }
 0x7c5   : > { %v738_v4 = vmul.f32 %v1660_v1, %v737_v3 }
 0x7c7   : > { %v739_v5 = vadd.f32 %v1660_v1, %v738_v4 }
 0x7c9   : > { %v743_v8 = vsel %vm742_vm9, %v1660_v1, %v739_v5  ;;  %v1457_v5 = vld [vmem:[%s2095_s20 + $0x28] sm:$0xff] }
 0x7ca   : > { %v748_v13 = vsel %vm745_vm10, %v747_v9, %v743_v8 }
 0x7cb   : > { %v751_v17 = vmul.f32 %v748_v13, %v684_v16 }
 0x810   : > { %v754_v11 = vpop.permute.xlu2 %753 }
 0x811   : > { %v756_v14 = vmul.f32 %v754_v11, %v748_v13  ;;  %v955_v11 = vstv %s954_s8 }
 0x812   : > { %vm956_vm4 = vcmp.lt.s32.totalorder %v955_v11, %v2121_v15 }
 0x813   : > { %758 = vrot.lane.b32.xlu1 %v756_v14, %s1940_s11 }
 0x885   : > { %v759_v19 = vpop.permute.xlu1 %758 }
 0x886   : > { %v761_v20 = vadd.f32 %v759_v19, %v751_v17 }
 0x888   : > { %1661 = vtanh.f32 %v761_v20  ;;  %v777_v56 = vsel %vm775_vm11, %v761_v20, %v684_v16 }
 0x88e   : > { %v1662_v21 = vpop.eup %1661 }
 0x88f   : > { %764 = vrot.lane.b32.xlu2 %v1662_v21, %s1939_s9 }
 0x8e9   : > { %v765_v25 = vpop.permute.xlu2 %764 }
 0x8ea   : > { %v2191_v26 = vmul.f32 %v765_v25, %v748_v13  ;;  %v957_v13 = vsel %vm956_vm4, 1, %v1941_v18 }
 0x8ec   : > { %v776_v27 = vsel %vm775_vm11, %v2191_v26, %v683_v54 }
 0x8ed   : > { %v787_v28 = vpack.c.bf16 %v776_v27, %v776_v27 }
 0x8ef   : > { %793 = vrot.lane.b32.xlu1 %v787_v28, %s1940_s11 }
 0x961   : > { %v794_v29 = vpop.permute.xlu1 %793 }
 0x962   : > { %1454 = vmatmul.msk.bf16.vlgmr.msrb.gmra.mxu0 %vm428_vm1, %v794_v29 }
 0x9df   : > { %v819_v31 = vpop.f32.mrf.mxu0 }
 0x9e0   : > { %v823_v32 = vadd.f32 %v1445_v30, %v819_v31 }
 0x9e2   : > { %1663 = vtanh.f32 %v823_v32  ;;  %v1455_v37 = vmul.f32 -1.442695, %v823_v32 }
 0x9e4   : > { %1665 = vpow2.f32 %v1455_v37 }
 0x9e7   : > { %v821_v33 = vpop.f32.mrf.mxu0 }
 0x9e8   : > { %v1664_v34 = vpop.eup %1663 }
 0x9e9   : > { %846 = vrot.lane.b32.xlu2 %v1664_v34, %s1939_s9 }
 0x9ea   : > { %v1666_v39 = vpop.eup %1665 }
 0x9eb   : > { %v827_v40 = vadd.f32 1.0, %v1666_v39  ;;  %v1517_v39 = vld [vmem:[#allocation7 + $0x8] sm:$0xff] }
 0x9ec   : > { %1002 = vmatpush.bf16.msrb.mxu2 %v1517_v39 }
 0x9ed   : > { %1667 = vrcp.f32 %v827_v40  ;;  %v839_v47 = vand.u32 2147483648, %v827_v40  ;;  %vm833_vm15 = vweird.f32 %v827_v40  ;;  %v837_v48 = vand.u32 2147483647, %v827_v40 }
 0x9ef   : > { %v840_v50 = vor.u32 1.1754944e-38, %v839_v47  ;;  %vm838_vm2 = vcmp.eq.f32.partialorder %v837_v48, 8.507059e+37  ;;  %v1469_v48 = vld [vmem:[%s2095_s20 + $0x30] sm:$0xff] }
 0x9f1   : > { %866 = vperm.xlu2 %1628, %v864_v36  }
 0x9f3   : > { %v1668_v42 = vpop.eup %1667 }
 0x9f4   : > { %v829_v43 = vmul.f32 %v1668_v42, %v827_v40  ;;  %vm834_vm14 = vweird.f32 %v1668_v42  ;;  %v1516_v40 = vld [vmem:[#allocation7] sm:$0xff] }
 0x9f5   : > { %vm835_vm0 = vmor %vm833_vm15, %vm834_vm14  ;;  %1003 = vmatpush.bf16.msrb.mxu2 %v1516_v40 }
 0x9f6   : > { %v830_v44 = vsub.f32 1.0, %v829_v43 }
 0x9f8   : > { %v831_v45 = vmul.f32 %v1668_v42, %v830_v44 }
 0x9fa   : > { %v832_v46 = vadd.f32 %v1668_v42, %v831_v45 }
 0x9fc   : > { %v836_v49 = vsel %vm835_vm0, %v1668_v42, %v832_v46 }
 0x9fd   : > { %v841_v54 = vsel %vm838_vm2, %v840_v50, %v836_v49 }
 0x9fe   : > { %v844_v57 = vmul.f32 %v841_v54, %v777_v56 }
 0xa43   : > { %v847_v52 = vpop.permute.xlu2 %846 }
 0xa44   : > { %v849_v55 = vmul.f32 %v847_v52, %v841_v54 }
 0xa46   : > { %851 = vrot.lane.b32.xlu0 %v849_v55, %s1940_s11  ;;  %v1048_v55 = vstv %s1047_s18 }
 0xa47   : > { %vm1049_vm14 = vcmp.lt.s32.totalorder %v1048_v55, %v2121_v15 }
 0xa4b   : > { %v2208_v63 = vpop.permute.xlu2 %866 }
 0xa4c   : > { %vm868_vm3 = vcmp.eq.s32.totalorder %v2208_v63, 1 }
 0xab8   : > { %v852_v58 = vpop.permute.xlu0 %851 }
 0xab9   : > { %v854_v59 = vadd.f32 %v852_v58, %v844_v57 }
 0xabb   : > { %1669 = vtanh.f32 %v854_v59  ;;  %v870_v33 = vsel %vm868_vm3, %v854_v59, %v777_v56  ;;  %v1050_v56 = vsel %vm1049_vm14, 1, %v1941_v18 }
 0xac1   : > { %v1670_v60 = vpop.eup %1669 }
 0xac2   : > { %857 = vrot.lane.b32.xlu1 %v1670_v60, %s1939_s9 }
 0xb34   : > { %v858_v0 = vpop.permute.xlu1 %857 }
 0xb35   : > { %v2210_v1 = vmul.f32 %v858_v0, %v841_v54 }
 0xb37   : > { %v869_v2 = vsel %vm868_vm3, %v2210_v1, %v776_v27 }
 0xb38   : > { %v880_v3 = vpack.c.bf16 %v869_v2, %v869_v2 }
 0xb3a   : > { %886 = vrot.lane.b32.xlu0 %v880_v3, %s1940_s11 }
 0xbac   : > { %v887_v4 = vpop.permute.xlu0 %886 }
 0xbad   : > { %1466 = vmatmul.msk.bf16.vlgmr.msrb.gmra.mxu1 %vm428_vm1, %v887_v4 }
 0xc2a   : > { %v912_v6 = vpop.f32.mrf.mxu1 }
 0xc2b   : > { %v916_v7 = vadd.f32 %v1457_v5, %v912_v6 }
 0xc2d   : > { %1671 = vtanh.f32 %v916_v7  ;;  %v1467_v14 = vmul.f32 -1.442695, %v916_v7 }
 0xc2f   : > { %1673 = vpow2.f32 %v1467_v14 }
 0xc32   : > { %v914_v8 = vpop.f32.mrf.mxu1 }
 0xc33   : > { %v1672_v9 = vpop.eup %1671 }
 0xc34   : > { %939 = vrot.lane.b32.xlu1 %v1672_v9, %s1939_s9 }
 0xc35   : > { %v1674_v16 = vpop.eup %1673 }
 0xc36   : > { %v920_v17 = vadd.f32 1.0, %v1674_v16 }
 0xc38   : > { %1675 = vrcp.f32 %v920_v17  ;;  %v932_v25 = vand.u32 2147483648, %v920_v17  ;;  %vm926_vm8 = vweird.f32 %v920_v17  ;;  %v930_v27 = vand.u32 2147483647, %v920_v17 }
 0xc3a   : > { %v933_v29 = vor.u32 1.1754944e-38, %v932_v25  ;;  %vm931_vm10 = vcmp.eq.f32.partialorder %v930_v27, 8.507059e+37 }
 0xc3c   : > { %959 = vperm.xlu1 %1629, %v957_v13  }
 0xc3e   : > { %v1676_v19 = vpop.eup %1675 }
 0xc3f   : > { %v922_v20 = vmul.f32 %v1676_v19, %v920_v17  ;;  %vm927_vm6 = vweird.f32 %v1676_v19 }
 0xc40   : > { %vm928_vm9 = vmor %vm926_vm8, %vm927_vm6 }
 0xc41   : > { %v923_v21 = vsub.f32 1.0, %v922_v20  ;;  %v1518_v20 = vld [vmem:[#allocation7] sm:$0xff] }
 0xc43   : > { %v924_v22 = vmul.f32 %v1676_v19, %v923_v21 }
 0xc45   : > { %v925_v23 = vadd.f32 %v1676_v19, %v924_v22 }
 0xc47   : > { %v929_v28 = vsel %vm928_vm9, %v1676_v19, %v925_v23  ;;  %v1519_v19 = vld [vmem:[#allocation7 + $0x8] sm:$0xff] }
 0xc48   : > { %v934_v31 = vsel %vm931_vm10, %v933_v29, %v929_v28  ;;  %1095 = vmatpush.bf16.msrb.mxu3 %v1519_v19  ;;  %v1481_v29 = vld [vmem:[%s2095_s20 + $0x38] sm:$0xff] }
 0xc49   : > { %v937_v34 = vmul.f32 %v934_v31, %v870_v33 }
 0xc4c   : > { %1096 = vmatpush.bf16.msrb.mxu3 %v1518_v20 }
 0xca6   : > { %v940_v30 = vpop.permute.xlu1 %939 }
 0xca7   : > { %v942_v32 = vmul.f32 %v940_v30, %v934_v31 }
 0xca9   : > { %944 = vrot.lane.b32.xlu2 %v942_v32, %s1940_s11 }
 0xcae   : > { %v2227_v42 = vpop.permute.xlu1 %959 }
 0xcaf   : > { %vm961_vm12 = vcmp.eq.s32.totalorder %v2227_v42, 1 }
 0xd03   : > { %v945_v35 = vpop.permute.xlu2 %944 }
 0xd04   : > { %v947_v36 = vadd.f32 %v945_v35, %v937_v34  ;;  %v1141_v34 = vstv %s1140_s4 }
 0xd05   : > { %vm1142_vm8 = vcmp.lt.s32.totalorder %v1141_v34, %v2121_v15 }
 0xd06   : > { %1677 = vtanh.f32 %v947_v36  ;;  %v2245_v11 = vsel %vm961_vm12, %v947_v36, %v870_v33  ;;  %v1143_v35 = vsel %vm1142_vm8, 1, %v1941_v18  ;;  %v685_v36 = vsel %vm682_vm5, %v2175_v53, 0.0 }
 0xd0c   : > { %v1678_v37 = vpop.eup %1677 }
 0xd0d   : > { %950 = vrot.lane.b32.xlu0 %v1678_v37, %s1939_s9 }
 0xd7f   : > { %v951_v43 = vpop.permute.xlu0 %950 }
 0xd80   : > { %v2229_v44 = vmul.f32 %v951_v43, %v934_v31 }
 0xd82   : > { %v962_v45 = vsel %vm961_vm12, %v2229_v44, %v869_v2  ;;  %v964_v37 = vsel %vm961_vm12, %v2229_v44, 0.0 }
 0xd83   : > { %v973_v46 = vpack.c.bf16 %v962_v45, %v962_v45 }
 0xd85   : > { %979 = vrot.lane.b32.xlu2 %v973_v46, %s1940_s11 }
 0xddf   : > { %v980_v47 = vpop.permute.xlu2 %979 }
 0xde0   : > { %1478 = vmatmul.msk.bf16.vlgmr.msrb.gmra.mxu2 %vm428_vm1, %v980_v47 }
 0xe63   : > { %v1005_v49 = vpop.f32.mrf.mxu2 }
 0xe64   : > { %v1009_v50 = vadd.f32 %v1469_v48, %v1005_v49 }
 0xe66   : > { %1679 = vtanh.f32 %v1009_v50  ;;  %v1479_v57 = vmul.f32 -1.442695, %v1009_v50 }
 0xe68   : > { %1681 = vpow2.f32 %v1479_v57 }
 0xe6b   : > { %v1007_v52 = vpop.f32.mrf.mxu2 }
 0xe6c   : > { %v1680_v54 = vpop.eup %1679 }
 0xe6d   : > { %1032 = vrot.lane.b32.xlu0 %v1680_v54, %s1939_s9  ;;  %v500_v54 = vsel %vm493_vm7, %v2134_v41, 0.0 }
 0xe6e   : > { %v1682_v58 = vpop.eup %1681 }
 0xe6f   : > { %v1013_v59 = vadd.f32 1.0, %v1682_v58 }
 0xe71   : > { %1683 = vrcp.f32 %v1013_v59  ;;  %v1025_v3 = vand.u32 2147483648, %v1013_v59  ;;  %vm1019_vm0 = vweird.f32 %v1013_v59  ;;  %v1023_v4 = vand.u32 2147483647, %v1013_v59 }
 0xe73   : > { %v1026_v6 = vor.u32 1.1754944e-38, %v1025_v3  ;;  %vm1024_vm4 = vcmp.eq.f32.partialorder %v1023_v4, 8.507059e+37  ;;  %v871_v3 = vsel %vm868_vm3, %v2210_v1, 0.0 }
 0xe75   : > { %1052 = vperm.xlu0 %1630, %v1050_v56   ;;  %v778_v56 = vsel %vm775_vm11, %v2191_v26, 0.0 }
 0xe77   : > { %v1684_v60 = vpop.eup %1683 }
 0xe78   : > { %v1015_v61 = vmul.f32 %v1684_v60, %v1013_v59  ;;  %vm1020_vm15 = vweird.f32 %v1684_v60 }
 0xe79   : > { %vm1021_vm2 = vmor %vm1019_vm0, %vm1020_vm15 }
 0xe7a   : > { %v1016_v62 = vsub.f32 1.0, %v1015_v61 }
 0xe7c   : > { %v1017_v0 = vmul.f32 %v1684_v60, %v1016_v62 }
 0xe7e   : > { %v1018_v2 = vadd.f32 %v1684_v60, %v1017_v0  ;;  %v592_v0 = vsel %vm589_vm13, %v2153_v12, 0.0 }
 0xe80   : > { %v1022_v5 = vsel %vm1021_vm2, %v1684_v60, %v1018_v2 }
 0xe81   : > { %v1027_v8 = vsel %vm1024_vm4, %v1026_v6, %v1022_v5 }
 0xe82   : > { %v1030_v13 = vmul.f32 %v1027_v8, %v2245_v11 }
 0xedf   : > { %v1033_v7 = vpop.permute.xlu0 %1032 }
 0xee0   : > { %v1035_v9 = vmul.f32 %v1033_v7, %v1027_v8 }
 0xee2   : > { %1037 = vrot.lane.b32.xlu1 %v1035_v9, %s1940_s11 }
 0xee7   : > { %v1053_v21 = vpop.permute.xlu0 %1052 }
 0xee8   : > { %vm1054_vm6 = vcmp.eq.s32.totalorder %v1053_v21, 1 }
 0xf54   : > { %v1038_v14 = vpop.permute.xlu1 %1037 }
 0xf55   : > { %v2248_v16 = vadd.f32 %v1038_v14, %v1030_v13 }
 0xf57   : > { %1685 = vtanh.f32 %v2248_v16  ;;  %v1056_v38 = vsel %vm1054_vm6, %v2248_v16, %v2245_v11 }
 0xf5d   : > { %v1686_v17 = vpop.eup %1685 }
 0xf5e   : > { %1043 = vrot.lane.b32.xlu2 %v1686_v17, %s1939_s9 }
 0xfb8   : > { %v1044_v22 = vpop.permute.xlu2 %1043 }
 0xfb9   : > { %v1046_v23 = vmul.f32 %v1044_v22, %v1027_v8 }
 0xfbb   : > { %v2253_v25 = vsel %vm1054_vm6, %v1046_v23, %v962_v45  ;;  %v1057_v58 = vsel %vm1054_vm6, %v1046_v23, 0.0 }
 0xfbc   : > { %v1066_v27 = vpack.c.bf16 %v2253_v25, %v2253_v25 }
 0xfbe   : > { %1072 = vrot.lane.b32.xlu1 %v1066_v27, %s1940_s11 }
0x1030   : > { %v1073_v28 = vpop.permute.xlu1 %1072 }
0x1031   : > { %1490 = vmatmul.msk.bf16.vlgmr.msrb.gmra.mxu3 %vm428_vm1, %v1073_v28 }
0x10b4   : > { %v1098_v30 = vpop.f32.mrf.mxu3 }
0x10b5   : > { %v1102_v31 = vadd.f32 %v1481_v29, %v1098_v30 }
0x10b7   : > { %1687 = vtanh.f32 %v1102_v31  ;;  %v1491_v39 = vmul.f32 -1.442695, %v1102_v31 }
0x10b9   : > { %1689 = vpow2.f32 %v1491_v39 }
0x10bc   : > { %v1100_v32 = vpop.f32.mrf.mxu3 }
0x10bd   : > { %v1688_v33 = vpop.eup %1687 }
0x10be   : > { %1125 = vrot.lane.b32.xlu2 %v1688_v33, %s1939_s9 }
0x10bf   : > { %v1690_v40 = vpop.eup %1689 }
0x10c0   : > { %v1106_v43 = vadd.f32 1.0, %v1690_v40 }
0x10c2   : > { %1691 = vrcp.f32 %v1106_v43  ;;  %v1118_v51 = vand.u32 2147483648, %v1106_v43  ;;  %vm1112_vm5 = vweird.f32 %v1106_v43  ;;  %v1116_v53 = vand.u32 2147483647, %v1106_v43 }
0x10c4   : > { %v1119_v44 = vor.u32 1.1754944e-38, %v1118_v51  ;;  %vm1117_vm12 = vcmp.eq.f32.partialorder %v1116_v53, 8.507059e+37 }
0x10c6   : > { %1145 = vperm.xlu2 %1628, %v1143_v35  }
0x10c8   : > { %v1692_v15 = vpop.eup %1691 }
0x10c9   : > { %v1108_v18 = vmul.f32 %v1692_v15, %v1106_v43  ;;  %vm1113_vm9 = vweird.f32 %v1692_v15 }
0x10ca   : > { %vm1114_vm10 = vmor %vm1112_vm5, %vm1113_vm9 }
0x10cb   : > { %v1109_v45 = vsub.f32 1.0, %v1108_v18 }
0x10cd   : > { %v1110_v46 = vmul.f32 %v1692_v15, %v1109_v45 }
0x10ce   : > { %687 = vrot.lane.b32.xlu2 %v685_v36, %s1940_s11 }
0x10cf   : > { %v1111_v47 = vadd.f32 %v1692_v15, %v1110_v46 }
0x10d1   : > { %v1115_v42 = vsel %vm1114_vm10, %v1692_v15, %v1111_v47 }
0x10d2   : > { %v1120_v49 = vsel %vm1117_vm12, %v1119_v44, %v1115_v42 }
0x10d3   : > { %v1123_v41 = vmul.f32 %v1120_v49, %v1056_v38 }
0x10d6   : > { %966 = vrot.lane.b32.xlu2 %v964_v37, %s1940_s11 }
0x1118   : > { %v1126_v48 = vpop.permute.xlu2 %1125 }
0x1119   : > { %v1128_v50 = vmul.f32 %v1126_v48, %v1120_v49 }
0x111b   : > { %1130 = vrot.lane.b32.xlu0 %v1128_v50, %s1940_s11 }
0x1120   : > { %v1146_v52 = vpop.permute.xlu2 %1145 }
0x1121   : > { %vm1147_vm7 = vcmp.eq.s32.totalorder %v1146_v52, 1 }
0x1123   : > { %502 = vrot.lane.b32.xlu0 %v500_v54, %s1940_s11 }
0x1128   : > { %v688_v55 = vpop.permute.xlu2 %687 }
0x1129   : > { %1432 = vst.msk [vmem:[%s2105_s2 + $0x10] sm:$0xff] %vm428_vm1, %v688_v55 }
0x112b   : > { %780 = vrot.lane.b32.xlu0 %v778_v56, %s1940_s11 }
0x1130   : > { %v967_v57 = vpop.permute.xlu2 %966 }
0x1131   : > { %1468 = vst.msk [vmem:[%s2105_s2 + $0x28] sm:$0xff] %vm428_vm1, %v967_v57 }
0x1133   : > { %1059 = vrot.lane.b32.xlu0 %v1057_v58, %s1940_s11 }
0x118d   : > { %v1131_v59 = vpop.permute.xlu0 %1130 }
0x118e   : > { %v1133_v24 = vadd.f32 %v1131_v59, %v1123_v41 }
0x1190   : > { %1693 = vtanh.f32 %v1133_v24  ;;  %v1149_v26 = vsel %vm1147_vm7, %v1133_v24, %v1056_v38 }
0x1191   : > { %1163 = vrot.lane.b32.xlu0 %v1149_v26, %s1942_s17 }
0x1195   : > { %v503_v60 = vpop.permute.xlu0 %502 }
0x1196   : > { %v1694_v61 = vpop.eup %1693  ;;  %505 = vst.msk [vmem:[%s2105_s2] sm:$0xff] %vm428_vm1, %v503_v60 }
0x1197   : > { %1136 = vrot.lane.b32.xlu1 %v1694_v61, %s1939_s9 }
0x119d   : > { %v781_v62 = vpop.permute.xlu0 %780 }
0x119e   : > { %1444 = vst.msk [vmem:[%s2105_s2 + $0x18] sm:$0xff] %vm428_vm1, %v781_v62 }
0x119f   : > { %594 = vrot.lane.b32.xlu1 %v592_v0, %s1940_s11 }
0x11a5   : > { %v1060_v2 = vpop.permute.xlu0 %1059 }
0x11a6   : > { %1480 = vst.msk [vmem:[%s2105_s2 + $0x30] sm:$0xff] %vm428_vm1, %v1060_v2 }
0x11a7   : > { %873 = vrot.lane.b32.xlu1 %v871_v3, %s1940_s11 }
0x1203   : > { %v1164_v4 = vpop.permute.xlu0 %1163 }
0x1204   : > { %1166 = vst.msk [vmem:[#allocation3] sm:$0xff] %vm428_vm1, %v1164_v4 }
0x1209   : > { %v1137_v5 = vpop.permute.xlu1 %1136 }
0x120a   : > { %v1139_v10 = vmul.f32 %v1137_v5, %v1120_v49 }
0x120c   : > { %v1150_v12 = vsel %vm1147_vm7, %v1139_v10, 0.0  ;;  %v1148_v6 = vsel %vm1147_vm7, %v1139_v10, %v2253_v25 }
0x120d   : > { %1152 = vrot.lane.b32.xlu1 %v1150_v12, %s1940_s11  ;;  %1158 = vrot.lane.b32.xlu2 %v1148_v6, %s1940_s11 }
0x1211   : > { %v595_v7 = vpop.permute.xlu1 %594 }
0x1212   : > { %1420 = vst.msk [vmem:[%s2105_s2 + $0x8] sm:$0xff] %vm428_vm1, %v595_v7 }
0x1219   : > { %v874_v63 = vpop.permute.xlu1 %873 }
0x121a   : > { %1456 = vst.msk [vmem:[%s2105_s2 + $0x20] sm:$0xff] %vm428_vm1, %v874_v63 }
0x1267   : > { %v1159_v1 = vpop.permute.xlu2 %1158 }
0x1268   : > { %1161 = vst.msk [vmem:[#allocation2] sm:$0xff] %vm428_vm1, %v1159_v1 }
0x127c   : > { %1170 = sbr.rel (%p1493_p1) target bundleno = 4739 (0x1283), region = 60 }
0x127f   : > { %v1153_v8 = vpop.permute.xlu1 %1152 }
0x1280   : > { %1492 = vst.msk [vmem:[%s2105_s2 + $0x38] sm:$0xff] %vm428_vm1, %v1153_v8 }
0x1281   : > { %1171 = vst.msk [vmem:[#allocation11] sm:$0xff] %vm428_vm1, %v1159_v1 }
0x1282   : > { %1172 = vst.msk [vmem:[#allocation13] sm:$0xff] %vm428_vm1, %v1164_v4 }
0x1283 PF: > { %s1943_s20 = smov [#allocation11]   ;;  %s1206_s11 = sshll.u32 %s2382_s6, 4  ;;  %s1207_s11 = int_to_ptr.hbm [resolvable:$true] %s1206_s11 }
0x1284   : > { %s1204_s7 = sshll.u32 %s1943_s20, 4  ;;  %s1520_s12 = sshll.u32 %s1923_s27, 6  ;;  %s1205_s7 = int_to_ptr.vmem [resolvable:$true] %s1204_s7 }
0x1285   : > { %1533 = dma.vmem_to_hbm [thread:$0]  (%p2025_p2), %s1205_s7, 128, %s1207_s11, [#allocation12]  }
0x1286   : > { %s1186_s17 = scalar_lea.hbm %s2381_s5, %s1520_s12  ;;  %s1187_s19 = sshll.u32 %s2105_s2, 4  ;;  %s1188_s19 = int_to_ptr.vmem [resolvable:$true] %s1187_s19 }
0x1287   : > { %s1189_s21 = sshll.u32 %s1186_s17, 4  ;;  %s1174_s23 = scalar_lea.sflag [#allocation6], %s2091_s14  ;;  %s1190_s21 = int_to_ptr.hbm [resolvable:$true] %s1189_s21 }
0x1288   : > { %s1827_s30 = sshra.s32 %s1190_s21, 4  ;;  %s1833_s27 = scalar_lea.hbm %s2381_s5, 128  ;;  %s1828_s30 = int_to_ptr.hbm [resolvable:$true] %s1827_s30 }
0x1289   : > { %s1829_s8 = scalar_lea.hbm %s1828_s30, 64  ;;  %p1834_p0 = scmp.lt.s32.totalorder %s1828_s30, %s2381_s5 }
0x128a   : > { %p1830_p4 = scmp.ne.s32.totalorder %s1828_s30, %s1829_s8  ;;  %p1835_p3 = scmp.lt.s32.totalorder %s1833_s27, %s1829_s8 }
0x128c   : > { %p1831_p12 = pnand %p1830_p4, %p2070_p7  ;;  %p1836_p5 = por %p1835_p3, %p1834_p0 }
0x128e   : > { %p1832_p13 = pneg %p1831_p12 }
0x1290   : > { %p1837_p9 = pnand %p1836_p5, %p1832_p13 }
0x1292   : > { %1840 = shalt.err (!%p1837_p9)
}
0x1293   : > { %s1944_s14 = smov 128   ;;  %s1945_s2 = smov 8  }
0x1294   : > { %1531 = dma.vmem_to_hbm [thread:$0]  (%p2070_p7), %s1188_s19, 1024, %s1190_s21, %s1174_s23, %s1944_s14, %s1944_s14, %s1945_s2  }
0x1295   : > { %s1946_s24 = smov [#allocation13]   ;;  %s2402_s16 = sld [smem:[#allocation23_spill]] }
0x1296   : > { %s1218_s9 = sshll.u32 %s1946_s24, 4  ;;  %s1219_s9 = int_to_ptr.vmem [resolvable:$true] %s1218_s9 }
0x129b   : > { %s1220_s13 = sshll.u32 %s2402_s16, 4  ;;  %s1221_s13 = int_to_ptr.hbm [resolvable:$true] %s1220_s13 }
0x129c   : > { %1535 = dma.vmem_to_hbm [thread:$0]  (%p2025_p2), %s1219_s9, 128, %s1221_s13, [#allocation12]  }
0x129d   : > { %1902 = dma.done.wait (%p2025_p2), [#allocation12], 256  }
0x129e   : > { %1904 = vsyncadd (%p2025_p2), [#allocation12], 4294967040 }
0x129f PF: > { %s2403_s17 = sld [smem:[#allocation18_spill]]  ;;  %p1553_p7 = pnand %p1388_p11, %p2036_p6 }
0x12a1   : > { %p1554_p10 = pneg %p1553_p7 }
0x12a5   : > { %s1242_s15 = sand.u32 1, %s2403_s17  }
0x12a6   : > { %s1243_s19 = scalar_lea.sflag [#allocation6], %s1242_s15 }
0x12a7   : > { %1906 = dma.done.wait (%p1554_p10), %s1243_s19, 1024  }
0x12a8   : > { %1908 = vsyncadd (%p1554_p10), %s1243_s19, 4294966272  ;;  %s26_s29 = sadd.s32 1, %s1931_s29   ;;  %s2405_s10 = sld [smem:[#allocation20_spill]] }
0x12a9   : > { %p23_p8 = scmp.ge.s32.totalorder %s26_s29, 4   ;;  %s2406_s24 = smov %s1915_s25 }
0x12aa   : > { %s2407_s25 = smov %s1919_s26  ;;  %s2408_s26 = smov %s2079_s22 }
0x12ab   : > { %s2409_s27 = smov %s1927_s28  ;;  %25 = sbr.rel (!%p23_p8) target bundleno = 12 (0xc), region = 140 }
0x12ae   : > { %s2410_s28 = smov %s2405_s10 }
0x12b0   :  { %1249 = vsyncpa [#allocation5], 1 }
0x12b1   :  { %1251 = vsyncpa [#allocation5 + $0x1], 1 }
0x12b2   :  { %1252 = vsyncpa [#allocation8], 1 }
0x12b3   :  { %1253 = vsyncpa [#allocation6], 1 }
0x12b4   :  { %1255 = vsyncpa [#allocation6 + $0x1], 1 }
0x12b5   :  { %1256 = vsyncpa [#allocation12], 1 }

</bundles_post_ra>
